<compile_context>
chip_gen: v7x
topology: tpu7x:2x2x1
jax: 0.10.0
libtpu: 0.0.40
codegen_flags: <defaults>
</compile_context>

<pallas_src>
import math

import jax
import jax.numpy as jnp
from jax.experimental import pallas as pl
from jax.experimental.pallas import tpu as pltpu


def rel_edge_conv_kernel(feat_ref, src_ref, dstc_ref, dstr_ref,
                         wn_ref, bn_ref,
                         we_src_ref, we_edge_ref, be_ref,
                         wl_feat_ref, wl_s_ref, bl_ref,
                         out_ref,
                         h_ref, acc_ref):
    k = pl.program_id(0)

    @pl.when(k == 0)
    def _init():
        feat = feat_ref[...]                                        # [Np, Fp]
        # h = neigh_linear(features), resident across all edge tiles.
        h_ref[...] = (jnp.dot(feat, wn_ref[...],
                              preferred_element_type=jnp.float32) + bn_ref[...])
        acc_ref[...] = jnp.zeros_like(acc_ref)
        # Hoisted edge-independent part of the final linear.
        out_ref[...] = (jnp.dot(feat, wl_feat_ref[...],
                                preferred_element_type=jnp.float32) + bl_ref[...])

    h = h_ref[...]                                                  # [Np, Fp]
    tE = src_ref.shape[0]
    Np = h.shape[0]

    src = src_ref[...]                                              # [tE, 1] int32
    dst_c = dstc_ref[...]                                           # [tE, 1] int32
    dst_r = dstr_ref[...]                                           # [1, tE] int32

    # Gather one-hots (edge-major): element (e, n) = (n == idx[e]).
    node_ids = jax.lax.broadcasted_iota(jnp.int32, (tE, Np), 1)
    src_oh = (node_ids == src).astype(jnp.float32)                  # [tE, Np]
    dst_oh = (node_ids == dst_c).astype(jnp.float32)                # [tE, Np]

    h_src = jnp.dot(src_oh, h, preferred_element_type=jnp.float32)  # [tE, Fp]
    h_dst = jnp.dot(dst_oh, h, preferred_element_type=jnp.float32)  # [tE, Fp]

    # edge_features = |h[src] - h[dst]|   (in_edge_features is None path)
    edge_feat = jnp.abs(h_src - h_dst)                              # [tE, Fp]

    # edge_linear(cat([h_src, edge_feat], -1)) split into two matmuls.
    new_h = (jnp.dot(h_src, we_src_ref[...], preferred_element_type=jnp.float32)
             + jnp.dot(edge_feat, we_edge_ref[...], preferred_element_type=jnp.float32)
             + be_ref[...])                                         # [tE, Fp]

    # Scatter-add by dst: build the transposed one-hot directly (no transpose),
    # element (n, e) = (n == dst[e]); padded edges use sentinel Np -> all-zero col.
    node_ids_t = jax.lax.broadcasted_iota(jnp.int32, (Np, tE), 0)
    dst_oh_t = (node_ids_t == dst_r).astype(jnp.float32)            # [Np, tE]
    acc_ref[...] += jnp.dot(dst_oh_t, new_h, preferred_element_type=jnp.float32)

    @pl.when(k == pl.num_programs(0) - 1)
    def _finalize():
        s = h + acc_ref[...]                                        # scatter into h.clone()
        out_ref[...] = out_ref[...] + jnp.dot(
            s, wl_s_ref[...], preferred_element_type=jnp.float32)


def _round_up(x, m):
    return ((x + m - 1) // m) * m


def rel_edge_conv(features, edge_index, params, *, edge_tile=256):
    """features: [N, F_in] f32, edge_index: [2, E] int (row 0 = src, row 1 = dst)."""
    # TODO(synk): only the in_edge_features=None path is implemented (edge
    # features derived from |h_src - h_dst|), matching the module's default.
    N, F = features.shape
    F_out = params["wl"].shape[1]
    E = edge_index.shape[1]

    Np = _round_up(N, 8)            # sublane-aligned node rows
    Fp = _round_up(F, 128)          # lane-dense feature dim
    Fop = _round_up(F_out, 128)     # lane-dense output dim
    tE = max(8, edge_tile)
    Ep = _round_up(max(E, 1), tE)
    n_tiles = Ep // tE

    f32 = jnp.float32
    feat_p = jnp.zeros((Np, Fp), f32).at[:N, :F].set(features.astype(f32))

    sentinel = jnp.int32(Np)        # never matches a real node id in [0, Np)
    src = edge_index[0].astype(jnp.int32)
    dst = edge_index[1].astype(jnp.int32)
    src_p = jnp.full((Ep,), sentinel, jnp.int32).at[:E].set(src)
    dst_p = jnp.full((Ep,), sentinel, jnp.int32).at[:E].set(dst)
    src_col = src_p.reshape(Ep, 1)
    dst_col = dst_p.reshape(Ep, 1)
    dst_row = dst_p.reshape(1, Ep)

    def pad2(w, rows, cols):
        w = jnp.asarray(w, f32)
        return jnp.zeros((rows, cols), f32).at[:w.shape[0], :w.shape[1]].set(w)

    wn = pad2(params["wn"], Fp, Fp)
    bn = pad2(params["bn"].reshape(1, -1), 1, Fp)
    we_src = pad2(params["we"][:F], Fp, Fp)      # split cat(h_src, ef) weight
    we_edge = pad2(params["we"][F:], Fp, Fp)
    be = pad2(params["be"].reshape(1, -1), 1, Fp)
    wl_feat = pad2(params["wl"][:F], Fp, Fop)    # split cat(feat, s) weight
    wl_s = pad2(params["wl"][F:], Fp, Fop)
    bl = pad2(params["bl"].reshape(1, -1), 1, Fop)

    def const_spec(shape):
        return pl.BlockSpec(shape, lambda k: (0, 0))

    grid_spec = pltpu.PrefetchScalarGridSpec(
        num_scalar_prefetch=0,
        grid=(n_tiles,),
        in_specs=[
            const_spec((Np, Fp)),                       # features (resident)
            pl.BlockSpec((tE, 1), lambda k: (k, 0)),    # src (column, per tile)
            pl.BlockSpec((tE, 1), lambda k: (k, 0)),    # dst (column, per tile)
            pl.BlockSpec((1, tE), lambda k: (0, k)),    # dst (lane-dense row, per tile)
            const_spec((Fp, Fp)),                       # wn
            const_spec((1, Fp)),                        # bn
            const_spec((Fp, Fp)),                       # we_src
            const_spec((Fp, Fp)),                       # we_edge
            const_spec((1, Fp)),                        # be
            const_spec((Fp, Fop)),                      # wl_feat
            const_spec((Fp, Fop)),                      # wl_s
            const_spec((1, Fop)),                       # bl
        ],
        out_specs=pl.BlockSpec((Np, Fop), lambda k: (0, 0)),   # resident accumulator
        scratch_shapes=[pltpu.VMEM((Np, Fp), f32),      # h (resident)
                        pltpu.VMEM((Np, Fp), f32)],     # scatter accumulator
    )

    flops = 2 * (Np * Fp * Fp            # h = feat @ wn
                 + 2 * Ep * Np * Fp      # one-hot gathers
                 + 2 * Ep * Fp * Fp      # edge linear
                 + Ep * Np * Fp          # scatter matmul
                 + 2 * Np * Fp * Fop)    # final linear
    bytes_accessed = 4 * (Np * Fp + Np * Fop + 3 * Ep
                          + 3 * Fp * Fp + 2 * Fp * Fop + 2 * Fp + Fop)

    out = pl.pallas_call(
        rel_edge_conv_kernel,
        out_shape=jax.ShapeDtypeStruct((Np, Fop), f32),
        grid_spec=grid_spec,
        compiler_params=pltpu.CompilerParams(
            dimension_semantics=("arbitrary",),          # edge axis is a reduction
            vmem_limit_bytes=48 * 1024 * 1024,           # explicit; safe on v5e/v6e/v7x
        ),
        cost_estimate=pl.CostEstimate(flops=flops, transcendentals=0,
                                      bytes_accessed=bytes_accessed),
    )(feat_p, src_col, dst_col, dst_row,
      wn, bn, we_src, we_edge, be, wl_feat, wl_s, bl)

    return out[:N, :F_out]


def _xavier_uniform(key, shape, gain):
    # shape is [fan_in, fan_out] in our [in, out] convention.
    fan_in, fan_out = shape
    bound = gain * math.sqrt(6.0 / (fan_in + fan_out))
    return jax.random.uniform(key, shape, jnp.float32, -bound, bound)


def init_params(key, in_node_features, out_features):
    gain = math.sqrt(2.0)  # nn.init.calculate_gain('relu')
    k1, k2, k3 = jax.random.split(key, 3)
    F = in_node_features
    return {
        "wn": _xavier_uniform(k1, (F, F), gain),
        "bn": jnp.zeros((F,), jnp.float32),
        "we": _xavier_uniform(k2, (2 * F, F), gain),
        "be": jnp.zeros((F,), jnp.float32),
        "wl": _xavier_uniform(k3, (2 * F, out_features), gain),
        "bl": jnp.zeros((out_features,), jnp.float32),
    }


def reference(features, edge_index, params):
    """Pure-JAX replica of the PyTorch forward for verification."""
    h = features @ params["wn"] + params["bn"]
    src, dst = edge_index[0], edge_index[1]
    ef = jnp.abs(h[src] - h[dst])
    new_h = jnp.concatenate([h[src], ef], axis=-1) @ params["we"] + params["be"]
    s = h.at[dst].add(new_h)                               # scatter sum into h.clone()
    z = jnp.concatenate([features, s], axis=-1) @ params["wl"] + params["bl"]
    return z


if __name__ == "__main__":
    # Small shapes that still exercise padding (N, F not aligned) and a
    # multi-tile edge grid (E=300 with edge_tile=128 -> 3 grid steps).
    N, F_IN, F_OUT, E = 40, 48, 24, 300

    key = jax.random.PRNGKey(0)
    k_feat, k_src, k_dst, k_par = jax.random.split(key, 4)

    features = jax.random.normal(k_feat, (N, F_IN), jnp.float32)
    edge_index = jnp.stack([
        jax.random.randint(k_src, (E,), 0, N, jnp.int32),
        jax.random.randint(k_dst, (E,), 0, N, jnp.int32),
    ], axis=0)                                             # [2, E]
    params = init_params(k_par, F_IN, F_OUT)

    out = jax.block_until_ready(
        rel_edge_conv(features, edge_index, params, edge_tile=128))
    ref = jax.block_until_ready(reference(features, edge_index, params))

    assert out.shape == (N, F_OUT)
    assert jnp.allclose(out, ref, atol=2e-4, rtol=2e-4), \
        float(jnp.max(jnp.abs(out - ref)))
    print("KERNEL_OK")
</pallas_src>

<mosaic_0001>
module attributes {stable_mosaic.version = 11 : i64} {
  func.func @rel_edge_conv_kernel(%arg0: i32, %arg1: memref<40x128xf32, #tpu.memory_space<vmem>>, %arg2: memref<128x1xi32, #tpu.memory_space<vmem>>, %arg3: memref<128x1xi32, #tpu.memory_space<vmem>>, %arg4: memref<1x128xi32, #tpu.memory_space<vmem>>, %arg5: memref<128x128xf32, #tpu.memory_space<vmem>>, %arg6: memref<1x128xf32, #tpu.memory_space<vmem>>, %arg7: memref<128x128xf32, #tpu.memory_space<vmem>>, %arg8: memref<128x128xf32, #tpu.memory_space<vmem>>, %arg9: memref<1x128xf32, #tpu.memory_space<vmem>>, %arg10: memref<128x128xf32, #tpu.memory_space<vmem>>, %arg11: memref<128x128xf32, #tpu.memory_space<vmem>>, %arg12: memref<1x128xf32, #tpu.memory_space<vmem>>, %arg13: memref<40x128xf32, #tpu.memory_space<vmem>>, %arg14: memref<40x128xf32, #tpu.memory_space<vmem>>, %arg15: memref<40x128xf32, #tpu.memory_space<vmem>>) attributes {dimension_semantics = [#tpu.dimension_semantics<arbitrary>], iteration_bounds = array<i64: 3>, scalar_prefetch = 0 : i64, scratch_operands = 2 : i64, tpu.core_type = #tpu.core_type<tc>, window_params = [{pipeline_mode = #tpu.pipeline_mode<synchronous>, transform_indices = @transform_0, window_bounds = array<i64: 40, 128>}, {transform_indices = @transform_1, window_bounds = array<i64: 128, 1>}, {transform_indices = @transform_2, window_bounds = array<i64: 128, 1>}, {transform_indices = @transform_3, window_bounds = array<i64: 1, 128>}, {pipeline_mode = #tpu.pipeline_mode<synchronous>, transform_indices = @transform_4, window_bounds = array<i64: 128, 128>}, {pipeline_mode = #tpu.pipeline_mode<synchronous>, transform_indices = @transform_5, window_bounds = array<i64: 1, 128>}, {pipeline_mode = #tpu.pipeline_mode<synchronous>, transform_indices = @transform_6, window_bounds = array<i64: 128, 128>}, {pipeline_mode = #tpu.pipeline_mode<synchronous>, transform_indices = @transform_7, window_bounds = array<i64: 128, 128>}, {pipeline_mode = #tpu.pipeline_mode<synchronous>, transform_indices = @transform_8, window_bounds = array<i64: 1, 128>}, {pipeline_mode = #tpu.pipeline_mode<synchronous>, transform_indices = @transform_9, window_bounds = array<i64: 128, 128>}, {pipeline_mode = #tpu.pipeline_mode<synchronous>, transform_indices = @transform_10, window_bounds = array<i64: 128, 128>}, {pipeline_mode = #tpu.pipeline_mode<synchronous>, transform_indices = @transform_11, window_bounds = array<i64: 1, 128>}, {pipeline_mode = #tpu.pipeline_mode<synchronous>, transform_indices = @transform_12, window_bounds = array<i64: 40, 128>}]} {
    %c0_i32 = arith.constant 0 : i32
    %0 = arith.cmpi eq, %arg0, %c0_i32 : i32
    %1 = arith.extui %0 : i1 to i32
    %c0_i32_0 = arith.constant 0 : i32
    %2 = arith.cmpi ne, %1, %c0_i32_0 : i32
    scf.if %2 {
      %c0_23 = arith.constant 0 : index
      %c0_24 = arith.constant 0 : index
      %40 = vector.load %arg1[%c0_23, %c0_24] : memref<40x128xf32, #tpu.memory_space<vmem>>, vector<40x128xf32>
      %c0_25 = arith.constant 0 : index
      %c0_26 = arith.constant 0 : index
      %41 = vector.load %arg5[%c0_25, %c0_26] : memref<128x128xf32, #tpu.memory_space<vmem>>, vector<128x128xf32>
      %cst_27 = arith.constant dense<0.000000e+00> : vector<40x128xf32>
      %42 = tpu.matmul %40, %41, %cst_27 {dimension_numbers = #tpu.dot_dimension_numbers<[1], [0], [0], [1], [0, 0, 1, 1], [], []>} : vector<40x128xf32>, vector<128x128xf32>, vector<40x128xf32> -> vector<40x128xf32>
      %c0_28 = arith.constant 0 : index
      %c0_29 = arith.constant 0 : index
      %43 = vector.load %arg6[%c0_28, %c0_29] : memref<1x128xf32, #tpu.memory_space<vmem>>, vector<1x128xf32>
      %44 = vector.broadcast %43 : vector<1x128xf32> to vector<40x128xf32>
      %45 = arith.addf %42, %44 : vector<40x128xf32>
      %c0_30 = arith.constant 0 : index
      %c0_31 = arith.constant 0 : index
      %46 = vector.load %arg14[%c0_30, %c0_31] : memref<40x128xf32, #tpu.memory_space<vmem>>, vector<40x128xf32>
      tpu.vector_store %arg14[%c0_30, %c0_31], %45 {strides = array<i32>} : memref<40x128xf32, #tpu.memory_space<vmem>>, vector<40x128xf32>,
      %cst_32 = arith.constant 0.000000e+00 : f32
      %47 = vector.broadcast %cst_32 : f32 to vector<40x128xf32>
      %c0_33 = arith.constant 0 : index
      %c0_34 = arith.constant 0 : index
      %48 = vector.load %arg15[%c0_33, %c0_34] : memref<40x128xf32, #tpu.memory_space<vmem>>, vector<40x128xf32>
      tpu.vector_store %arg15[%c0_33, %c0_34], %47 {strides = array<i32>} : memref<40x128xf32, #tpu.memory_space<vmem>>, vector<40x128xf32>,
      %c0_35 = arith.constant 0 : index
      %c0_36 = arith.constant 0 : index
      %49 = vector.load %arg10[%c0_35, %c0_36] : memref<128x128xf32, #tpu.memory_space<vmem>>, vector<128x128xf32>
      %cst_37 = arith.constant dense<0.000000e+00> : vector<40x128xf32>
      %50 = tpu.matmul %40, %49, %cst_37 {dimension_numbers = #tpu.dot_dimension_numbers<[1], [0], [0], [1], [0, 0, 1, 1], [], []>} : vector<40x128xf32>, vector<128x128xf32>, vector<40x128xf32> -> vector<40x128xf32>
      %c0_38 = arith.constant 0 : index
      %c0_39 = arith.constant 0 : index
      %51 = vector.load %arg12[%c0_38, %c0_39] : memref<1x128xf32, #tpu.memory_space<vmem>>, vector<1x128xf32>
      %52 = vector.broadcast %51 : vector<1x128xf32> to vector<40x128xf32>
      %53 = arith.addf %50, %52 : vector<40x128xf32>
      %c0_40 = arith.constant 0 : index
      %c0_41 = arith.constant 0 : index
      %54 = vector.load %arg13[%c0_40, %c0_41] : memref<40x128xf32, #tpu.memory_space<vmem>>, vector<40x128xf32>
      tpu.vector_store %arg13[%c0_40, %c0_41], %53 {strides = array<i32>} : memref<40x128xf32, #tpu.memory_space<vmem>>, vector<40x128xf32>,
    } else {
    }
    %c0 = arith.constant 0 : index
    %c0_1 = arith.constant 0 : index
    %3 = vector.load %arg14[%c0, %c0_1] : memref<40x128xf32, #tpu.memory_space<vmem>>, vector<40x128xf32>
    %c0_2 = arith.constant 0 : index
    %c0_3 = arith.constant 0 : index
    %4 = vector.load %arg2[%c0_2, %c0_3] : memref<128x1xi32, #tpu.memory_space<vmem>>, vector<128x1xi32>
    %c0_4 = arith.constant 0 : index
    %c0_5 = arith.constant 0 : index
    %5 = vector.load %arg3[%c0_4, %c0_5] : memref<128x1xi32, #tpu.memory_space<vmem>>, vector<128x1xi32>
    %c0_6 = arith.constant 0 : index
    %c0_7 = arith.constant 0 : index
    %6 = vector.load %arg4[%c0_6, %c0_7] : memref<1x128xi32, #tpu.memory_space<vmem>>, vector<1x128xi32>
    %7 = tpu.iota {dimensions = array<i32: 1>} : vector<128x40xi32>
    %8 = vector.broadcast %4 : vector<128x1xi32> to vector<128x40xi32>
    %9 = arith.cmpi eq, %7, %8 : vector<128x40xi32>
    %10 = arith.extui %9 : vector<128x40xi1> to vector<128x40xi32>
    %11 = arith.sitofp %10 : vector<128x40xi32> to vector<128x40xf32>
    %12 = vector.broadcast %5 : vector<128x1xi32> to vector<128x40xi32>
    %13 = arith.cmpi eq, %7, %12 : vector<128x40xi32>
    %14 = arith.extui %13 : vector<128x40xi1> to vector<128x40xi32>
    %15 = arith.sitofp %14 : vector<128x40xi32> to vector<128x40xf32>
    %cst = arith.constant dense<0.000000e+00> : vector<128x128xf32>
    %16 = tpu.matmul %11, %3, %cst {dimension_numbers = #tpu.dot_dimension_numbers<[1], [0], [0], [1], [0, 0, 1, 1], [], []>} : vector<128x40xf32>, vector<40x128xf32>, vector<128x128xf32> -> vector<128x128xf32>
    %cst_8 = arith.constant dense<0.000000e+00> : vector<128x128xf32>
    %17 = tpu.matmul %15, %3, %cst_8 {dimension_numbers = #tpu.dot_dimension_numbers<[1], [0], [0], [1], [0, 0, 1, 1], [], []>} : vector<128x40xf32>, vector<40x128xf32>, vector<128x128xf32> -> vector<128x128xf32>
    %18 = arith.subf %16, %17 : vector<128x128xf32>
    %19 = math.absf %18 : vector<128x128xf32>
    %c0_9 = arith.constant 0 : index
    %c0_10 = arith.constant 0 : index
    %20 = vector.load %arg7[%c0_9, %c0_10] : memref<128x128xf32, #tpu.memory_space<vmem>>, vector<128x128xf32>
    %cst_11 = arith.constant dense<0.000000e+00> : vector<128x128xf32>
    %21 = tpu.matmul %16, %20, %cst_11 {dimension_numbers = #tpu.dot_dimension_numbers<[1], [0], [0], [1], [0, 0, 1, 1], [], []>} : vector<128x128xf32>, vector<128x128xf32>, vector<128x128xf32> -> vector<128x128xf32>
    %c0_12 = arith.constant 0 : index
    %c0_13 = arith.constant 0 : index
    %22 = vector.load %arg8[%c0_12, %c0_13] : memref<128x128xf32, #tpu.memory_space<vmem>>, vector<128x128xf32>
    %cst_14 = arith.constant dense<0.000000e+00> : vector<128x128xf32>
    %23 = tpu.matmul %19, %22, %cst_14 {dimension_numbers = #tpu.dot_dimension_numbers<[1], [0], [0], [1], [0, 0, 1, 1], [], []>} : vector<128x128xf32>, vector<128x128xf32>, vector<128x128xf32> -> vector<128x128xf32>
    %24 = arith.addf %21, %23 : vector<128x128xf32>
    %c0_15 = arith.constant 0 : index
    %c0_16 = arith.constant 0 : index
    %25 = vector.load %arg9[%c0_15, %c0_16] : memref<1x128xf32, #tpu.memory_space<vmem>>, vector<1x128xf32>
    %26 = vector.broadcast %25 : vector<1x128xf32> to vector<128x128xf32>
    %27 = arith.addf %24, %26 : vector<128x128xf32>
    %28 = tpu.iota {dimensions = array<i32: 0>} : vector<40x128xi32>
    %29 = vector.broadcast %6 : vector<1x128xi32> to vector<40x128xi32>
    %30 = arith.cmpi eq, %28, %29 : vector<40x128xi32>
    %31 = arith.extui %30 : vector<40x128xi1> to vector<40x128xi32>
    %32 = arith.sitofp %31 : vector<40x128xi32> to vector<40x128xf32>
    %c0_17 = arith.constant 0 : index
    %c0_18 = arith.constant 0 : index
    %33 = vector.load %arg15[%c0_17, %c0_18] : memref<40x128xf32, #tpu.memory_space<vmem>>, vector<40x128xf32>
    %cst_19 = arith.constant dense<0.000000e+00> : vector<40x128xf32>
    %34 = tpu.matmul %32, %27, %cst_19 {dimension_numbers = #tpu.dot_dimension_numbers<[1], [0], [0], [1], [0, 0, 1, 1], [], []>} : vector<40x128xf32>, vector<128x128xf32>, vector<40x128xf32> -> vector<40x128xf32>
    %35 = arith.addf %33, %34 : vector<40x128xf32>
    %c0_20 = arith.constant 0 : index
    %c0_21 = arith.constant 0 : index
    %36 = vector.load %arg15[%c0_20, %c0_21] : memref<40x128xf32, #tpu.memory_space<vmem>>, vector<40x128xf32>
    tpu.vector_store %arg15[%c0_20, %c0_21], %35 {strides = array<i32>} : memref<40x128xf32, #tpu.memory_space<vmem>>, vector<40x128xf32>,
    %c2_i32 = arith.constant 2 : i32
    %37 = arith.cmpi eq, %arg0, %c2_i32 : i32
    %38 = arith.extui %37 : i1 to i32
    %c0_i32_22 = arith.constant 0 : i32
    %39 = arith.cmpi ne, %38, %c0_i32_22 : i32
    scf.if %39 {
      %c0_23 = arith.constant 0 : index
      %c0_24 = arith.constant 0 : index
      %40 = vector.load %arg15[%c0_23, %c0_24] : memref<40x128xf32, #tpu.memory_space<vmem>>, vector<40x128xf32>
      %41 = arith.addf %3, %40 : vector<40x128xf32>
      %c0_25 = arith.constant 0 : index
      %c0_26 = arith.constant 0 : index
      %42 = vector.load %arg13[%c0_25, %c0_26] : memref<40x128xf32, #tpu.memory_space<vmem>>, vector<40x128xf32>
      %c0_27 = arith.constant 0 : index
      %c0_28 = arith.constant 0 : index
      %43 = vector.load %arg11[%c0_27, %c0_28] : memref<128x128xf32, #tpu.memory_space<vmem>>, vector<128x128xf32>
      %cst_29 = arith.constant dense<0.000000e+00> : vector<40x128xf32>
      %44 = tpu.matmul %41, %43, %cst_29 {dimension_numbers = #tpu.dot_dimension_numbers<[1], [0], [0], [1], [0, 0, 1, 1], [], []>} : vector<40x128xf32>, vector<128x128xf32>, vector<40x128xf32> -> vector<40x128xf32>
      %45 = arith.addf %42, %44 : vector<40x128xf32>
      %c0_30 = arith.constant 0 : index
      %c0_31 = arith.constant 0 : index
      %46 = vector.load %arg13[%c0_30, %c0_31] : memref<40x128xf32, #tpu.memory_space<vmem>>, vector<40x128xf32>
      tpu.vector_store %arg13[%c0_30, %c0_31], %45 {strides = array<i32>} : memref<40x128xf32, #tpu.memory_space<vmem>>, vector<40x128xf32>,
    } else {
    }
    return
  }
  func.func @transform_0(%arg0: i32) -> (i32, i32) {
    %c0_i32 = arith.constant 0 : i32
    %c0_i32_0 = arith.constant 0 : i32
    %c0_i32_1 = arith.constant 0 : i32
    return %c0_i32, %c0_i32_0 : i32, i32
  }
  func.func @transform_1(%arg0: i32) -> (i32, i32) {
    %c0_i32 = arith.constant 0 : i32
    %c0_i32_0 = arith.constant 0 : i32
    return %arg0, %c0_i32 : i32, i32
  }
  func.func @transform_2(%arg0: i32) -> (i32, i32) {
    %c0_i32 = arith.constant 0 : i32
    %c0_i32_0 = arith.constant 0 : i32
    return %arg0, %c0_i32 : i32, i32
  }
  func.func @transform_3(%arg0: i32) -> (i32, i32) {
    %c0_i32 = arith.constant 0 : i32
    %c0_i32_0 = arith.constant 0 : i32
    return %c0_i32, %arg0 : i32, i32
  }
  func.func @transform_4(%arg0: i32) -> (i32, i32) {
    %c0_i32 = arith.constant 0 : i32
    %c0_i32_0 = arith.constant 0 : i32
    %c0_i32_1 = arith.constant 0 : i32
    return %c0_i32, %c0_i32_0 : i32, i32
  }
  func.func @transform_5(%arg0: i32) -> (i32, i32) {
    %c0_i32 = arith.constant 0 : i32
    %c0_i32_0 = arith.constant 0 : i32
    %c0_i32_1 = arith.constant 0 : i32
    return %c0_i32, %c0_i32_0 : i32, i32
  }
  func.func @transform_6(%arg0: i32) -> (i32, i32) {
    %c0_i32 = arith.constant 0 : i32
    %c0_i32_0 = arith.constant 0 : i32
    %c0_i32_1 = arith.constant 0 : i32
    return %c0_i32, %c0_i32_0 : i32, i32
  }
  func.func @transform_7(%arg0: i32) -> (i32, i32) {
    %c0_i32 = arith.constant 0 : i32
    %c0_i32_0 = arith.constant 0 : i32
    %c0_i32_1 = arith.constant 0 : i32
    return %c0_i32, %c0_i32_0 : i32, i32
  }
  func.func @transform_8(%arg0: i32) -> (i32, i32) {
    %c0_i32 = arith.constant 0 : i32
    %c0_i32_0 = arith.constant 0 : i32
    %c0_i32_1 = arith.constant 0 : i32
    return %c0_i32, %c0_i32_0 : i32, i32
  }
  func.func @transform_9(%arg0: i32) -> (i32, i32) {
    %c0_i32 = arith.constant 0 : i32
    %c0_i32_0 = arith.constant 0 : i32
    %c0_i32_1 = arith.constant 0 : i32
    return %c0_i32, %c0_i32_0 : i32, i32
  }
  func.func @transform_10(%arg0: i32) -> (i32, i32) {
    %c0_i32 = arith.constant 0 : i32
    %c0_i32_0 = arith.constant 0 : i32
    %c0_i32_1 = arith.constant 0 : i32
    return %c0_i32, %c0_i32_0 : i32, i32
  }
  func.func @transform_11(%arg0: i32) -> (i32, i32) {
    %c0_i32 = arith.constant 0 : i32
    %c0_i32_0 = arith.constant 0 : i32
    %c0_i32_1 = arith.constant 0 : i32
    return %c0_i32, %c0_i32_0 : i32, i32
  }
  func.func @transform_12(%arg0: i32) -> (i32, i32) {
    %c0_i32 = arith.constant 0 : i32
    %c0_i32_0 = arith.constant 0 : i32
    %c0_i32_1 = arith.constant 0 : i32
    return %c0_i32, %c0_i32_0 : i32, i32
  }
}

</mosaic_0001>

<bundles_post_ra>
// kernel: tpu_custom_call.1
= control target key start
LH: loop header
LB: loop body
LE: loop exit
PB: predicated region body
PF: predicated region fallthrough
CT: control target
= control target key end

     0   :  { %17 = vsyncpa [#allocation5], 0  ;;  %s3039_s21 = smov 0   ;;  %s3615_s0 = inlined_call_operand.vmem [shape: f32[40,128], index: 0, kind: input, shape index: {}]   ;;  %s3616_s1 = inlined_call_operand.vmem [shape: s32[384,1], index: 1, kind: input, shape index: {}]   ;;  %s3617_s2 = inlined_call_operand.vmem [shape: s32[384,1], index: 2, kind: input, shape index: {}]   ;;  %s3618_s3 = inlined_call_operand.vmem [shape: s32[1,384], index: 3, kind: input, shape index: {}]   ;;  %s3619_s4 = inlined_call_operand.vmem [shape: f32[128,128], index: 4, kind: input, shape index: {}]   ;;  %s3620_s5 = inlined_call_operand.vmem [shape: f32[1,128], index: 5, kind: input, shape index: {}]   ;;  %s3621_s6 = inlined_call_operand.vmem [shape: f32[128,128], index: 6, kind: input, shape index: {}]   ;;  %s3622_s7 = inlined_call_operand.vmem [shape: f32[128,128], index: 7, kind: input, shape index: {}]   ;;  %s3623_s8 = inlined_call_operand.vmem [shape: f32[1,128], index: 8, kind: input, shape index: {}]   ;;  %s3624_s9 = inlined_call_operand.vmem [shape: f32[128,128], index: 9, kind: input, shape index: {}]   ;;  %s3625_s10 = inlined_call_operand.vmem [shape: f32[128,128], index: 10, kind: input, shape index: {}]   ;;  %s3626_s11 = inlined_call_operand.vmem [shape: f32[1,128], index: 11, kind: input, shape index: {}]   ;;  %s3627_s12 = inlined_call_operand.hbm [shape: f32[40,128], index: 12, kind: output, shape index: {}]  }
   0x1 LB: > { %s3045_s22 = sadd.s32 4294967295, %s2958_s21   ;;  %p2021_p0 = scmp.ge.s32.totalorder %s2958_s21, 1  ;;  %s2958_s21 = sphi %s3039_s21, %s23_s21  }
   0x2   : > { %p378_p1 = scmp.lt.s32.totalorder %s2958_s21, 4 }
   0x4   : > { %p379_p2 = pnand %p2021_p0, %p378_p1 }
   0x5   : > { %s2022_s23 = sshll.u32 (!%p379_p2), %s3045_s22, 4  ;;  %p435_p3 = scmp.lt.s32.totalorder (!%p379_p2), %s3045_s22, 2 }
   0x6   : > { %382 = sbr.rel (%p379_p2) target bundleno = 1386 (0x56a), region = 68  ;;  %p424_p4 = scmp.lt.s32.totalorder (!%p379_p2), %s2022_s23, 47 }
   0x7   : > { %p2026_p5 = scmp.ne.s32.totalorder (!%p379_p2), %s3045_s22, 0 }
   0xd   : > { %s3052_s24 = scalar_select %p435_p3, %s3045_s22, 2 }
   0xe   : > { %s3629_s23 = smov (!%p424_p4, %s2022_s23), 47  ;;  %441 = sbr.rel (%p2026_p5) target bundleno = 281 (0x119), region = 72 }
   0xf   : > { %s437_s27 = scalar_lea.vmem %s3618_s3, %s3052_s24  ;;  %s2023_s28 = sshll.u32 %s3629_s23, 3  ;;  %v447_v0 = vld [vmem:[%s3619_s4] sm:$0xff] (!%p2026_p5)  ;;  %v448_v1 = vld [vmem:[%s3619_s4 + $0x8] sm:$0xff] (!%p2026_p5)  ;;  %v2960_v3 = vmov (!%p2026_p5), 0.0|0.0   ;;  %v449_v6 = vld [vmem:[%s3619_s4 + $0x10] sm:$0xff] (!%p2026_p5)  ;;  %v2961_v8 = vmov (!%p2026_p5), 0.0  }
  0x10   : > { %s3061_s13 = scalar_lea.vmem %s3616_s1, %s2023_s28  ;;  %s3066_s16 = scalar_lea.vmem %s3617_s2, %s2023_s28  ;;  %v570_v2 = vld [vmem:[%s3624_s9] sm:$0xff] (!%p2026_p5)  ;;  %2668 = vmatprep.subr.bf16.mxu0 (!%p2026_p5), %v2960_v3  ;;  %2692 = vmatprep.subr.bf16.mxu1 (!%p2026_p5), %v2960_v3  ;;  %v2669_v4 = vpack.c.bf16 (!%p2026_p5), %v448_v1, %v447_v0  ;;  %v571_v5 = vld [vmem:[%s3624_s9 + $0x8] sm:$0xff] (!%p2026_p5)  ;;  %v450_v7 = vld [vmem:[%s3619_s4 + $0x18] sm:$0xff] (!%p2026_p5)  ;;  %565 = vst [vmem:[#allocation3] sm:$0xff] (!%p2026_p5), %v2961_v8  ;;  %vm2962_vm0 = vmmov (!%p2026_p5), 0  }
  0x11   : > { %566 = vst [vmem:[#allocation3 + $0x8] sm:$0xff] (!%p2026_p5), %v2961_v8  ;;  %567 = vst [vmem:[#allocation3 + $0x10] sm:$0xff] (!%p2026_p5), %v2961_v8  ;;  %v2693_v9 = vpack.c.bf16 (!%p2026_p5), %v571_v5, %v570_v2  ;;  %v572_v10 = vld [vmem:[%s3624_s9 + $0x10] sm:$0xff] (!%p2026_p5)  ;;  %v573_v11 = vld [vmem:[%s3624_s9 + $0x18] sm:$0xff] (!%p2026_p5)  ;;  %2332 = vmatprep.mubr.msk.f32.mxu0 (!%p2026_p5), %vm2962_vm0, %v2961_v8  ;;  %2379 = vmatprep.mubr.msk.f32.mxu1 (!%p2026_p5), %vm2962_vm0, %v2961_v8  ;;  %v2672_v12 = vpack.c.bf16 (!%p2026_p5), %v450_v7, %v449_v6 }
  0x12   : > { %568 = vst [vmem:[#allocation3 + $0x18] sm:$0xff] (!%p2026_p5), %v2961_v8  ;;  %569 = vst [vmem:[#allocation3 + $0x20] sm:$0xff] (!%p2026_p5), %v2961_v8  ;;  %2670 = vmatpush3.bf16.msra.mxu0 (!%p2026_p5), %v2669_v4  ;;  %v2696_v13 = vpack.c.bf16 (!%p2026_p5), %v573_v11, %v572_v10  ;;  %v451_v14 = vld [vmem:[%s3619_s4 + $0x20] sm:$0xff] (!%p2026_p5)  ;;  %v452_v15 = vld [vmem:[%s3619_s4 + $0x28] sm:$0xff] (!%p2026_p5) }
  0x13   : > { %2694 = vmatpush3.bf16.msra.mxu1 (!%p2026_p5), %v2693_v9  ;;  %2671 = vmatprep.subr.bf16.mxu0 (!%p2026_p5), %v2960_v3  ;;  %v574_v16 = vld [vmem:[%s3624_s9 + $0x20] sm:$0xff] (!%p2026_p5)  ;;  %v575_v17 = vld [vmem:[%s3624_s9 + $0x28] sm:$0xff] (!%p2026_p5)  ;;  %v2675_v18 = vpack.c.bf16 (!%p2026_p5), %v452_v15, %v451_v14  ;;  %v453_v20 = vld [vmem:[%s3619_s4 + $0x30] sm:$0xff] (!%p2026_p5) }
  0x14   : > { %2695 = vmatprep.subr.bf16.mxu1 (!%p2026_p5), %v2960_v3  ;;  %v2699_v19 = vpack.c.bf16 (!%p2026_p5), %v575_v17, %v574_v16  ;;  %v454_v21 = vld [vmem:[%s3619_s4 + $0x38] sm:$0xff] (!%p2026_p5)  ;;  %v576_v22 = vld [vmem:[%s3624_s9 + $0x30] sm:$0xff] (!%p2026_p5)  ;;  %v455_v26 = vld [vmem:[%s3619_s4 + $0x40] sm:$0xff] (!%p2026_p5) }
  0x15   : > { %v577_v23 = vld [vmem:[%s3624_s9 + $0x38] sm:$0xff]  ;;  %v2678_v24 = vpack.c.bf16 %v454_v21, %v453_v20  ;;  %v456_v27 = vld [vmem:[%s3619_s4 + $0x48] sm:$0xff]  ;;  %v578_v28 = vld [vmem:[%s3624_s9 + $0x40] sm:$0xff] }
  0x16   : > { %2673 = vmatpush3.bf16.msra.mxu0 %v2672_v12  ;;  %v2702_v25 = vpack.c.bf16 %v577_v23, %v576_v22  ;;  %v579_v29 = vld [vmem:[%s3624_s9 + $0x48] sm:$0xff]  ;;  %v2681_v30 = vpack.c.bf16 %v456_v27, %v455_v26  ;;  %v457_v32 = vld [vmem:[%s3619_s4 + $0x50] sm:$0xff]  ;;  %v458_v33 = vld [vmem:[%s3619_s4 + $0x58] sm:$0xff] }
  0x17   : > { %2697 = vmatpush3.bf16.msra.mxu1 %v2696_v13  ;;  %2674 = vmatprep.subr.bf16.mxu0 %v2960_v3  ;;  %v2705_v31 = vpack.c.bf16 %v579_v29, %v578_v28  ;;  %v580_v34 = vld [vmem:[%s3624_s9 + $0x50] sm:$0xff]  ;;  %v581_v35 = vld [vmem:[%s3624_s9 + $0x58] sm:$0xff]  ;;  %v2684_v36 = vpack.c.bf16 %v458_v33, %v457_v32  ;;  %v459_v38 = vld [vmem:[%s3619_s4 + $0x60] sm:$0xff] }
  0x18   : > { %2698 = vmatprep.subr.bf16.mxu1 %v2960_v3  ;;  %v2708_v37 = vpack.c.bf16 %v581_v35, %v580_v34  ;;  %v460_v39 = vld [vmem:[%s3619_s4 + $0x68] sm:$0xff]  ;;  %v582_v40 = vld [vmem:[%s3624_s9 + $0x60] sm:$0xff]  ;;  %v461_v44 = vld [vmem:[%s3619_s4 + $0x70] sm:$0xff] }
  0x19   : > { %v583_v41 = vld [vmem:[%s3624_s9 + $0x68] sm:$0xff]  ;;  %v2687_v42 = vpack.c.bf16 %v460_v39, %v459_v38  ;;  %v462_v45 = vld [vmem:[%s3619_s4 + $0x78] sm:$0xff]  ;;  %v584_v46 = vld [vmem:[%s3624_s9 + $0x70] sm:$0xff] }
  0x1a   : > { %2676 = vmatpush3.bf16.msra.mxu0 %v2675_v18  ;;  %v2711_v43 = vpack.c.bf16 %v583_v41, %v582_v40  ;;  %v585_v47 = vld [vmem:[%s3624_s9 + $0x78] sm:$0xff]  ;;  %v2690_v48 = vpack.c.bf16 %v462_v45, %v461_v44  ;;  %v442_v50 = vld [vmem:[%s3615_s0] sm:$0xff]  ;;  %v443_v51 = vld [vmem:[%s3615_s0 + $0x8] sm:$0xff] }
  0x1b   : > { %2700 = vmatpush3.bf16.msra.mxu1 %v2699_v19  ;;  %2677 = vmatprep.subr.bf16.mxu0 %v2960_v3  ;;  %v2714_v49 = vpack.c.bf16 %v585_v47, %v584_v46  ;;  %v444_v52 = vld [vmem:[%s3615_s0 + $0x10] sm:$0xff]  ;;  %v445_v53 = vld [vmem:[%s3615_s0 + $0x18] sm:$0xff]  ;;  %v446_v54 = vld [vmem:[%s3615_s0 + $0x20] sm:$0xff] }
  0x1c   : > { %2701 = vmatprep.subr.bf16.mxu1 %v2960_v3  ;;  %v2027_v55 = vld [vmem:[%s3620_s5] ss:$0 sm:$0xff] }
  0x1d   : > { %v2028_v56 = vld [vmem:[%s3626_s11] ss:$0 sm:$0xff] }
  0x1e   : > { %2679 = vmatpush3.bf16.msra.mxu0 %v2678_v24 }
  0x1f   : > { %2703 = vmatpush3.bf16.msra.mxu1 %v2702_v25  ;;  %2680 = vmatprep.subr.bf16.mxu0 %v2960_v3 }
  0x20   : > { %2704 = vmatprep.subr.bf16.mxu1 %v2960_v3 }
  0x22   : > { %2682 = vmatpush3.bf16.msra.mxu0 %v2681_v30 }
  0x23   : > { %2706 = vmatpush3.bf16.msra.mxu1 %v2705_v31  ;;  %2683 = vmatprep.subr.bf16.mxu0 %v2960_v3 }
  0x24   : > { %2707 = vmatprep.subr.bf16.mxu1 %v2960_v3 }
  0x26   : > { %2685 = vmatpush3.bf16.msra.mxu0 %v2684_v36 }
  0x27   : > { %2709 = vmatpush3.bf16.msra.mxu1 %v2708_v37  ;;  %2686 = vmatprep.subr.bf16.mxu0 %v2960_v3 }
  0x28   : > { %2710 = vmatprep.subr.bf16.mxu1 %v2960_v3 }
  0x2a   : > { %2688 = vmatpush3.bf16.msra.mxu0 %v2687_v42 }
  0x2b   : > { %2712 = vmatpush3.bf16.msra.mxu1 %v2711_v43  ;;  %2689 = vmatprep.subr.bf16.mxu0 %v2960_v3 }
  0x2c   : > { %2713 = vmatprep.subr.bf16.mxu1 %v2960_v3 }
  0x2e   : > { %2691 = vmatpush3.bf16.msra.mxu0 %v2690_v48 }
  0x2f   : > { %2715 = vmatpush3.bf16.msra.mxu1 %v2714_v49 }
  0x31   : > { %2333 = vmatmul.mubr.f32.vlgmr.msra.gmra.mrb[0].mxu0 %v442_v50 }
  0x32   : > { %2380 = vmatmul.mubr.f32.vlgmr.msra.gmra.mrb[0].mxu1 %v442_v50  ;;  %2335 = vmatprep.mubr.msk.f32.mxu0 %vm2962_vm0, %v2961_v8 }
  0x33   : > { %2382 = vmatprep.mubr.msk.f32.mxu1 %vm2962_vm0, %v2961_v8 }
  0x35   : > { %2336 = vmatmul.mubr.f32.gmra.mrb[2].mxu0 %v443_v51 }
  0x36   : > { %2383 = vmatmul.mubr.f32.gmra.mrb[2].mxu1 %v443_v51  ;;  %2338 = vmatprep.mubr.msk.f32.mxu0 %vm2962_vm0, %v2961_v8 }
  0x37   : > { %2385 = vmatprep.mubr.msk.f32.mxu1 %vm2962_vm0, %v2961_v8 }
  0x39   : > { %2339 = vmatmul.mubr.f32.gmra.mrb[4].mxu0 %v444_v52 }
  0x3a   : > { %2386 = vmatmul.mubr.f32.gmra.mrb[4].mxu1 %v444_v52  ;;  %2341 = vmatprep.mubr.msk.f32.mxu0 %vm2962_vm0, %v2961_v8 }
  0x3b   : > { %2388 = vmatprep.mubr.msk.f32.mxu1 %vm2962_vm0, %v2961_v8 }
  0x3d   : > { %2342 = vmatmul.mubr.f32.gmra.mrb[6].mxu0 %v445_v53 }
  0x3e   : > { %2389 = vmatmul.mubr.f32.gmra.mrb[6].mxu1 %v445_v53  ;;  %2344 = vmatprep.mubr.msk.f32.mxu0 %vm2962_vm0, %v2961_v8 }
  0x3f   : > { %2391 = vmatprep.mubr.msk.f32.mxu1 %vm2962_vm0, %v2961_v8 }
  0x41   : > { %2345 = vmatmul.mubr.f32.gmra.mrb[8].mxu0 %v446_v54 }
  0x42   : > { %2392 = vmatmul.mubr.f32.gmra.mrb[8].mxu1 %v446_v54 }
 0x104   : > { %v536_v57 = vpop.f32.mrb[0].mxu0 }
 0x105   : > { %v537_v58 = vadd.f32 %v2027_v55, %v536_v57  ;;  %v659_v59 = vpop.f32.mrb[0].mxu1  ;;  %v2334_v60 = vpop.f32.mrb[1].mxu0 }
 0x106   : > { %v660_v61 = vadd.f32 %v2028_v56, %v659_v59  ;;  %v2381_v62 = vpop.f32.mrb[1].mxu1 }
 0x107   : > { %560 = vst [vmem:[#allocation2] sm:$0xff] %v537_v58 }
 0x108   : > { %683 = vst [vmem:[#allocation4] sm:$0xff] %v660_v61  ;;  %v541_v63 = vpop.f32.mrb[2].mxu0 }
 0x109   : > { %v542_v0 = vadd.f32 %v2027_v55, %v541_v63  ;;  %v664_v1 = vpop.f32.mrb[2].mxu1  ;;  %v2337_v2 = vpop.f32.mrb[3].mxu0 }
 0x10a   : > { %v665_v3 = vadd.f32 %v2028_v56, %v664_v1  ;;  %v2384_v4 = vpop.f32.mrb[3].mxu1 }
 0x10b   : > { %561 = vst [vmem:[#allocation2 + $0x8] sm:$0xff] %v542_v0 }
 0x10c   : > { %684 = vst [vmem:[#allocation4 + $0x8] sm:$0xff] %v665_v3  ;;  %v546_v5 = vpop.f32.mrb[4].mxu0 }
 0x10d   : > { %v547_v6 = vadd.f32 %v2027_v55, %v546_v5  ;;  %v669_v7 = vpop.f32.mrb[4].mxu1  ;;  %v2340_v8 = vpop.f32.mrb[5].mxu0 }
 0x10e   : > { %v670_v9 = vadd.f32 %v2028_v56, %v669_v7  ;;  %v2387_v10 = vpop.f32.mrb[5].mxu1 }
 0x10f   : > { %562 = vst [vmem:[#allocation2 + $0x10] sm:$0xff] %v547_v6 }
 0x110   : > { %685 = vst [vmem:[#allocation4 + $0x10] sm:$0xff] %v670_v9  ;;  %v551_v11 = vpop.f32.mrb[6].mxu0 }
 0x111   : > { %v552_v12 = vadd.f32 %v2027_v55, %v551_v11  ;;  %v674_v13 = vpop.f32.mrb[6].mxu1  ;;  %v2343_v14 = vpop.f32.mrb[7].mxu0 }
 0x112   : > { %v675_v15 = vadd.f32 %v2028_v56, %v674_v13  ;;  %v2390_v16 = vpop.f32.mrb[7].mxu1 }
 0x113   : > { %563 = vst [vmem:[#allocation2 + $0x18] sm:$0xff] %v552_v12 }
 0x114   : > { %686 = vst [vmem:[#allocation4 + $0x18] sm:$0xff] %v675_v15  ;;  %v556_v17 = vpop.f32.mrb[8].mxu0 }
 0x115   : > { %v557_v18 = vadd.f32 %v2027_v55, %v556_v17  ;;  %v679_v19 = vpop.f32.mrb[8].mxu1  ;;  %v2346_v20 = vpop.f32.mrb[9].mxu0 }
 0x116   : > { %v680_v21 = vadd.f32 %v2028_v56, %v679_v19  ;;  %v2393_v22 = vpop.f32.mrb[9].mxu1 }
 0x117   : > { %564 = vst [vmem:[#allocation2 + $0x20] sm:$0xff] %v557_v18 }
 0x118   : > { %687 = vst [vmem:[#allocation4 + $0x20] sm:$0xff] %v680_v21 }
 0x119 PF: > { %v694_v23 = vld [vmem:[%s3061_s13 + $0x8] sm:$0xff]  ;;  %v693_v24 = vld [vmem:[%s3061_s13] sm:$0xff]  ;;  %v2963_v25 = vmov 0   ;;  %v711_v28 = vld [vmem:[%s3066_s16 + $0x10] sm:$0xff]  ;;  %v726_v5 = vlaneseq  ;;  %vm920_vm1 = vcmask 326656   ;;  %v2964_v11 = vmov 0.0  }
 0x11a   : > { %2921 = vset.pattern.permute.xlu1 %v2963_v25  ;;  %2920 = vset.pattern.permute.xlu0 %v2963_v25  ;;  %v710_v26 = vld [vmem:[%s3066_s16 + $0x8] sm:$0xff]  ;;  %v709_v27 = vld [vmem:[%s3066_s16] sm:$0xff]  ;;  %v695_v29 = vld [vmem:[%s3061_s13 + $0x10] sm:$0xff]  ;;  %p2105_p6 = scmp.ne.s32.totalorder %s3045_s22, 2 }
 0x11b   : > { %732 = vperm.xlu1 %2921, %v694_v23   ;;  %729 = vperm.xlu0 %2920, %v693_v24   ;;  %v712_v30 = vld [vmem:[%s3066_s16 + $0x18] sm:$0xff]  ;;  %v3235_v32 = vld [vmem:[#allocation2] sm:$0xff]  ;;  %v3237_v33 = vld [vmem:[#allocation2 + $0x8] sm:$0xff]  ;;  %v3290_v6 = vand.u32 127, %v726_v5 }
 0x11c   : > { %v696_v31 = vld [vmem:[%s3061_s13 + $0x18] sm:$0xff]  ;;  %v3239_v34 = vld [vmem:[#allocation2 + $0x10] sm:$0xff]  ;;  %v2716_v36 = vpack.c.bf16 %v3237_v33, %v3235_v32  ;;  %v713_v38 = vld [vmem:[%s3066_s16 + $0x20] sm:$0xff] }
 0x11d   : > { %v3241_v35 = vld [vmem:[#allocation2 + $0x18] sm:$0xff]  ;;  %v697_v39 = vld [vmem:[%s3061_s13 + $0x20] sm:$0xff]  ;;  %v714_v41 = vld [vmem:[%s3066_s16 + $0x28] sm:$0xff] }
 0x11e   : > { %v2720_v37 = vpack.c.bf16 %v3241_v35, %v3239_v34  ;;  %2717 = vmatprep.subr.bf16.mxu0 %v2716_v36  ;;  %2725 = vmatprep.subr.bf16.mxu1 %v2716_v36  ;;  %v3249_v40 = vld [vmem:[#allocation2 + $0x20] sm:$0xff]  ;;  %v698_v42 = vld [vmem:[%s3061_s13 + $0x28] sm:$0xff]  ;;  %v715_v43 = vld [vmem:[%s3066_s16 + $0x30] sm:$0xff] }
 0x11f   : > { %828 = vperm.xlu1 %2921, %v710_v26   ;;  %825 = vperm.xlu0 %2920, %v709_v27   ;;  %v699_v44 = vld [vmem:[%s3061_s13 + $0x30] sm:$0xff]  ;;  %v716_v45 = vld [vmem:[%s3066_s16 + $0x38] sm:$0xff]  ;;  %v717_v47 = vld [vmem:[%s3066_s16 + $0x40] sm:$0xff] }
 0x120   : > { %2719 = vmatpush3.bf16.msra.mxu0 %v2716_v36  ;;  %2727 = vmatpush3.bf16.msra.mxu1 %v2716_v36  ;;  %v700_v46 = vld [vmem:[%s3061_s13 + $0x38] sm:$0xff]  ;;  %v701_v48 = vld [vmem:[%s3061_s13 + $0x40] sm:$0xff]  ;;  %v718_v49 = vld [vmem:[%s3066_s16 + $0x48] sm:$0xff] }
 0x121   : > { %2721 = vmatprep.subr.bf16.mxu0 %v2720_v37  ;;  %2729 = vmatprep.subr.bf16.mxu1 %v2720_v37  ;;  %v702_v50 = vld [vmem:[%s3061_s13 + $0x48] sm:$0xff]  ;;  %v719_v51 = vld [vmem:[%s3066_s16 + $0x50] sm:$0xff]  ;;  %v720_v53 = vld [vmem:[%s3066_s16 + $0x58] sm:$0xff] }
 0x122   : > { %v703_v52 = vld [vmem:[%s3061_s13 + $0x50] sm:$0xff]  ;;  %v704_v54 = vld [vmem:[%s3061_s13 + $0x58] sm:$0xff]  ;;  %v721_v55 = vld [vmem:[%s3066_s16 + $0x60] sm:$0xff] }
 0x123   : > { %831 = vperm.xlu1 %2921, %v711_v28   ;;  %735 = vperm.xlu0 %2920, %v695_v29   ;;  %v705_v56 = vld [vmem:[%s3061_s13 + $0x60] sm:$0xff]  ;;  %v722_v57 = vld [vmem:[%s3066_s16 + $0x68] sm:$0xff]  ;;  %v723_v59 = vld [vmem:[%s3066_s16 + $0x70] sm:$0xff] }
 0x124   : > { %2723 = vmatpush3.bf16.msra.mxu0 %v2720_v37  ;;  %2731 = vmatpush3.bf16.msra.mxu1 %v2720_v37  ;;  %v706_v58 = vld [vmem:[%s3061_s13 + $0x68] sm:$0xff]  ;;  %v707_v60 = vld [vmem:[%s3061_s13 + $0x70] sm:$0xff]  ;;  %v724_v61 = vld [vmem:[%s3066_s16 + $0x78] sm:$0xff] }
 0x125   : > { %2402 = vmatprep.subr.mxu0 %v3249_v40  ;;  %2436 = vmatprep.subr.mxu1 %v3249_v40  ;;  %v708_v62 = vld [vmem:[%s3061_s13 + $0x78] sm:$0xff]  ;;  %v1339_v63 = vld [vmem:[%s3621_s6] sm:$0xff]  ;;  %v1340_v0 = vld [vmem:[%s3621_s6 + $0x8] sm:$0xff] }
 0x126   : > { %v2764_v1 = vpack.c.bf16 %v1340_v0, %v1339_v63  ;;  %v1355_v2 = vld [vmem:[%s3622_s7] sm:$0xff]  ;;  %v1356_v3 = vld [vmem:[%s3622_s7 + $0x8] sm:$0xff]  ;;  %v1341_v7 = vld [vmem:[%s3621_s6 + $0x10] sm:$0xff] }
 0x127   : > { %834 = vperm.xlu1 %2921, %v712_v30   ;;  %738 = vperm.xlu0 %2920, %v696_v31   ;;  %v2732_v4 = vpack.c.bf16 %v1356_v3, %v1355_v2  ;;  %v1342_v8 = vld [vmem:[%s3621_s6 + $0x18] sm:$0xff]  ;;  %v1343_v15 = vld [vmem:[%s3621_s6 + $0x20] sm:$0xff]  ;;  %v1344_v16 = vld [vmem:[%s3621_s6 + $0x28] sm:$0xff] }
 0x128   : > { %2403 = vmatpush3.msra.mxu0 %v3249_v40  ;;  %2437 = vmatpush3.msra.mxu1 %v3249_v40  ;;  %v2768_v14 = vpack.c.bf16 %v1342_v8, %v1341_v7  ;;  %v1357_v17 = vld [vmem:[%s3622_s7 + $0x10] sm:$0xff]  ;;  %v1358_v18 = vld [vmem:[%s3622_s7 + $0x18] sm:$0xff]  ;;  %v2772_v23 = vpack.c.bf16 %v1344_v16, %v1343_v15  ;;  %v1359_v27 = vld [vmem:[%s3622_s7 + $0x20] sm:$0xff] }
 0x129   : > { %2765 = vmatprep.subr.bf16.mxu0 %v2764_v1  ;;  %2733 = vmatprep.subr.bf16.mxu1 %v2732_v4  ;;  %v2736_v24 = vpack.c.bf16 %v1358_v18, %v1357_v17  ;;  %v1345_v25 = vld [vmem:[%s3621_s6 + $0x30] sm:$0xff]  ;;  %v1346_v26 = vld [vmem:[%s3621_s6 + $0x38] sm:$0xff]  ;;  %v1360_v28 = vld [vmem:[%s3622_s7 + $0x28] sm:$0xff] }
 0x12a   : > { %v2776_v37 = vpack.c.bf16 %v1346_v26, %v1345_v25  ;;  %v1366_v63 = vld [vmem:[%s3622_s7 + $0x58] sm:$0xff]  ;;  %v1353_v8 = vld [vmem:[%s3621_s6 + $0x70] sm:$0xff] }
 0x12b   : > { %837 = vperm.xlu1 %2921, %v713_v38   ;;  %741 = vperm.xlu0 %2920, %v697_v39   ;;  %v2740_v38 = vpack.c.bf16 %v1360_v28, %v1359_v27  ;;  %v1347_v39 = vld [vmem:[%s3621_s6 + $0x40] sm:$0xff] }
 0x12f   : > { %840 = vperm.xlu1 %2921, %v714_v41   ;;  %744 = vperm.xlu0 %2920, %v698_v42   ;;  %v1348_v41 = vld [vmem:[%s3621_s6 + $0x48] sm:$0xff]  ;;  %v1361_v42 = vld [vmem:[%s3622_s7 + $0x30] sm:$0xff] }
 0x133   : > { %843 = vperm.xlu1 %2921, %v715_v43   ;;  %747 = vperm.xlu0 %2920, %v699_v44   ;;  %v1362_v43 = vld [vmem:[%s3622_s7 + $0x38] sm:$0xff] }
 0x137   : > { %846 = vperm.xlu1 %2921, %v716_v45   ;;  %750 = vperm.xlu0 %2920, %v700_v46  }
 0x13b   : > { %849 = vperm.xlu1 %2921, %v717_v47   ;;  %753 = vperm.xlu0 %2920, %v701_v48   ;;  %v2780_v48 = vpack.c.bf16 %v1348_v41, %v1347_v39 }
 0x13f   : > { %852 = vperm.xlu1 %2921, %v718_v49   ;;  %756 = vperm.xlu0 %2920, %v702_v50   ;;  %v2744_v49 = vpack.c.bf16 %v1362_v43, %v1361_v42  ;;  %v1349_v50 = vld [vmem:[%s3621_s6 + $0x50] sm:$0xff] }
 0x143   : > { %855 = vperm.xlu1 %2921, %v719_v51   ;;  %759 = vperm.xlu0 %2920, %v703_v52   ;;  %v1350_v51 = vld [vmem:[%s3621_s6 + $0x58] sm:$0xff]  ;;  %v1363_v52 = vld [vmem:[%s3622_s7 + $0x40] sm:$0xff] }
 0x147   : > { %858 = vperm.xlu1 %2921, %v720_v53   ;;  %762 = vperm.xlu0 %2920, %v704_v54   ;;  %v1364_v53 = vld [vmem:[%s3622_s7 + $0x48] sm:$0xff] }
 0x14b   : > { %861 = vperm.xlu1 %2921, %v721_v55   ;;  %765 = vperm.xlu0 %2920, %v705_v56  }
 0x14f   : > { %864 = vperm.xlu1 %2921, %v722_v57   ;;  %768 = vperm.xlu0 %2920, %v706_v58   ;;  %v2784_v58 = vpack.c.bf16 %v1350_v51, %v1349_v50 }
 0x153   : > { %867 = vperm.xlu1 %2921, %v723_v59   ;;  %771 = vperm.xlu0 %2920, %v707_v60   ;;  %v2748_v59 = vpack.c.bf16 %v1364_v53, %v1363_v52  ;;  %v1351_v60 = vld [vmem:[%s3621_s6 + $0x60] sm:$0xff] }
 0x157   : > { %870 = vperm.xlu1 %2921, %v724_v61   ;;  %774 = vperm.xlu0 %2920, %v708_v62   ;;  %v1352_v61 = vld [vmem:[%s3621_s6 + $0x68] sm:$0xff]  ;;  %v1365_v62 = vld [vmem:[%s3622_s7 + $0x50] sm:$0xff] }
 0x158   : > { %v2752_v7 = vpack.c.bf16 %v1366_v63, %v1365_v62 }
 0x19a   : > { %v733_v9 = vpop.permute.xlu1 %732  ;;  %v730_v10 = vpop.permute.xlu0 %729 }
 0x19b   : > { %vm777_vm2 = vcmp.eq.s32.totalorder %v3290_v6, %v733_v9  ;;  %vm776_vm3 = vcmp.eq.s32.totalorder %v3290_v6, %v730_v10  ;;  %v1354_v9 = vld [vmem:[%s3621_s6 + $0x78] sm:$0xff] }
 0x19c   : > { %v2030_v12 = vsel %vm777_vm2, 1.0, %v2964_v11  ;;  %v2029_v13 = vsel %vm776_vm3, 1.0, %v2964_v11  ;;  %v2792_v15 = vpack.c.bf16 %v1354_v9, %v1353_v8 }
 0x19d   : > { %2404 = vmatprep.mubr.msk.f32.mxu0 %vm920_vm1, %v2029_v13 }
 0x19e   : > { %v829_v19 = vpop.permute.xlu1 %828  ;;  %v826_v20 = vpop.permute.xlu0 %825  ;;  %2405 = vmatmul.mubr.msk.f32.vlgmr.msra.gmra.mrb[0].mxu0 %vm920_vm1, %v2030_v12 }
 0x19f   : > { %vm873_vm4 = vcmp.eq.s32.totalorder %v3290_v6, %v829_v19  ;;  %vm872_vm5 = vcmp.eq.s32.totalorder %v3290_v6, %v826_v20  ;;  %2767 = vmatpush3.bf16.msra.mxu0 %v2764_v1 }
 0x1a0   : > { %v2046_v21 = vsel %vm873_vm4, 1.0, %v2964_v11  ;;  %v2045_v22 = vsel %vm872_vm5, 1.0, %v2964_v11  ;;  %2769 = vmatprep.subr.bf16.mxu0 %v2768_v14 }
 0x1a1   : > { %2438 = vmatprep.mubr.msk.f32.mxu1 %vm920_vm1, %v2045_v22 }
 0x1a2   : > { %v832_v29 = vpop.permute.xlu1 %831  ;;  %v736_v30 = vpop.permute.xlu0 %735  ;;  %2439 = vmatmul.mubr.msk.f32.vlgmr.msra.gmra.mrb[0].mxu1 %vm920_vm1, %v2046_v21 }
 0x1a3   : > { %vm874_vm6 = vcmp.eq.s32.totalorder %v3290_v6, %v832_v29  ;;  %vm778_vm7 = vcmp.eq.s32.totalorder %v3290_v6, %v736_v30  ;;  %2771 = vmatpush3.bf16.msra.mxu0 %v2768_v14  ;;  %2735 = vmatpush3.bf16.msra.mxu1 %v2732_v4  ;;  %v2788_v4 = vpack.c.bf16 %v1352_v61, %v1351_v60  ;;  %v1370_v60 = vld [vmem:[%s3622_s7 + $0x78] sm:$0xff] }
 0x1a4   : > { %v2047_v31 = vsel %vm874_vm6, 1.0, %v2964_v11  ;;  %v2031_v36 = vsel %vm778_vm7, 1.0, %v2964_v11  ;;  %2773 = vmatprep.subr.bf16.mxu0 %v2772_v23  ;;  %2737 = vmatprep.subr.bf16.mxu1 %v2736_v24 }
 0x1a5   : > { %2407 = vmatprep.mubr.msk.f32.mxu0 %vm920_vm1, %v2031_v36  ;;  %2441 = vmatprep.mubr.msk.f32.mxu1 %vm920_vm1, %v2047_v31 }
 0x1a6   : > { %v835_v44 = vpop.permute.xlu1 %834  ;;  %v739_v45 = vpop.permute.xlu0 %738 }
 0x1a7   : > { %vm875_vm8 = vcmp.eq.s32.totalorder %v3290_v6, %v835_v44  ;;  %vm779_vm9 = vcmp.eq.s32.totalorder %v3290_v6, %v739_v45  ;;  %2775 = vmatpush3.bf16.msra.mxu0 %v2772_v23  ;;  %2739 = vmatpush3.bf16.msra.mxu1 %v2736_v24 }
 0x1a8   : > { %v2048_v46 = vsel %vm875_vm8, 1.0, %v2964_v11  ;;  %v2032_v47 = vsel %vm779_vm9, 1.0, %v2964_v11  ;;  %2777 = vmatprep.subr.bf16.mxu0 %v2776_v37  ;;  %2741 = vmatprep.subr.bf16.mxu1 %v2740_v38 }
 0x1a9   : > { %2408 = vmatmul.mubr.msk.f32.gmra.mrb[2].mxu0 %vm920_vm1, %v2032_v47  ;;  %2442 = vmatmul.mubr.msk.f32.gmra.mrb[2].mxu1 %vm920_vm1, %v2048_v46 }
 0x1aa   : > { %v838_v54 = vpop.permute.xlu1 %837  ;;  %v742_v55 = vpop.permute.xlu0 %741 }
 0x1ab   : > { %vm876_vm10 = vcmp.eq.s32.totalorder %v3290_v6, %v838_v54  ;;  %vm780_vm11 = vcmp.eq.s32.totalorder %v3290_v6, %v742_v55  ;;  %2779 = vmatpush3.bf16.msra.mxu0 %v2776_v37  ;;  %2743 = vmatpush3.bf16.msra.mxu1 %v2740_v38 }
 0x1ac   : > { %v2049_v56 = vsel %vm876_vm10, 1.0, %v2964_v11  ;;  %v2033_v57 = vsel %vm780_vm11, 1.0, %v2964_v11  ;;  %2781 = vmatprep.subr.bf16.mxu0 %v2780_v48  ;;  %2745 = vmatprep.subr.bf16.mxu1 %v2744_v49 }
 0x1ad   : > { %2410 = vmatprep.mubr.msk.f32.mxu0 %vm920_vm1, %v2033_v57  ;;  %2444 = vmatprep.mubr.msk.f32.mxu1 %vm920_vm1, %v2049_v56  ;;  %v1367_v57 = vld [vmem:[%s3622_s7 + $0x60] sm:$0xff] }
 0x1ae   : > { %v841_v0 = vpop.permute.xlu1 %840  ;;  %v745_v1 = vpop.permute.xlu0 %744 }
 0x1af   : > { %vm877_vm12 = vcmp.eq.s32.totalorder %v3290_v6, %v841_v0  ;;  %vm781_vm13 = vcmp.eq.s32.totalorder %v3290_v6, %v745_v1  ;;  %2783 = vmatpush3.bf16.msra.mxu0 %v2780_v48  ;;  %2747 = vmatpush3.bf16.msra.mxu1 %v2744_v49 }
 0x1b0   : > { %v2050_v2 = vsel %vm877_vm12, 1.0, %v2964_v11  ;;  %v2034_v3 = vsel %vm781_vm13, 1.0, %v2964_v11  ;;  %2785 = vmatprep.subr.bf16.mxu0 %v2784_v58  ;;  %2749 = vmatprep.subr.bf16.mxu1 %v2748_v59 }
 0x1b1   : > { %2411 = vmatmul.mubr.msk.f32.gmra.mrb[4].mxu0 %vm920_vm1, %v2034_v3  ;;  %2445 = vmatmul.mubr.msk.f32.gmra.mrb[4].mxu1 %vm920_vm1, %v2050_v2 }
 0x1b2   : > { %v844_v10 = vpop.permute.xlu1 %843  ;;  %v748_v12 = vpop.permute.xlu0 %747 }
 0x1b3   : > { %vm878_vm14 = vcmp.eq.s32.totalorder %v3290_v6, %v844_v10  ;;  %vm782_vm15 = vcmp.eq.s32.totalorder %v3290_v6, %v748_v12  ;;  %2787 = vmatpush3.bf16.msra.mxu0 %v2784_v58  ;;  %2751 = vmatpush3.bf16.msra.mxu1 %v2748_v59  ;;  %v1368_v58 = vld [vmem:[%s3622_s7 + $0x68] sm:$0xff] }
 0x1b4   : > { %v2051_v13 = vsel %vm878_vm14, 1.0, %v2964_v11  ;;  %v2035_v14 = vsel %vm782_vm15, 1.0, %v2964_v11  ;;  %2789 = vmatprep.subr.bf16.mxu0 %v2788_v4  ;;  %2753 = vmatprep.subr.bf16.mxu1 %v2752_v7  ;;  %v2756_v59 = vpack.c.bf16 %v1368_v58, %v1367_v57 }
 0x1b5   : > { %2413 = vmatprep.mubr.msk.f32.mxu0 %vm920_vm1, %v2035_v14  ;;  %2447 = vmatprep.mubr.msk.f32.mxu1 %vm920_vm1, %v2051_v13 }
 0x1b6   : > { %v847_v16 = vpop.permute.xlu1 %846  ;;  %v751_v17 = vpop.permute.xlu0 %750 }
 0x1b7   : > { %vm879_vm0 = vcmp.eq.s32.totalorder %v3290_v6, %v847_v16  ;;  %vm783_vm2 = vcmp.eq.s32.totalorder %v3290_v6, %v751_v17  ;;  %2791 = vmatpush3.bf16.msra.mxu0 %v2788_v4  ;;  %2755 = vmatpush3.bf16.msra.mxu1 %v2752_v7 }
 0x1b8   : > { %v2052_v18 = vsel %vm879_vm0, 1.0, %v2964_v11  ;;  %v2036_v19 = vsel %vm783_vm2, 1.0, %v2964_v11  ;;  %2793 = vmatprep.subr.bf16.mxu0 %v2792_v15  ;;  %2757 = vmatprep.subr.bf16.mxu1 %v2756_v59 }
 0x1b9   : > { %2414 = vmatmul.mubr.msk.f32.gmra.mrb[6].mxu0 %vm920_vm1, %v2036_v19  ;;  %2448 = vmatmul.mubr.msk.f32.gmra.mrb[6].mxu1 %vm920_vm1, %v2052_v18 }
 0x1ba   : > { %v850_v20 = vpop.permute.xlu1 %849  ;;  %v754_v21 = vpop.permute.xlu0 %753 }
 0x1bb   : > { %vm880_vm3 = vcmp.eq.s32.totalorder %v3290_v6, %v850_v20  ;;  %vm784_vm4 = vcmp.eq.s32.totalorder %v3290_v6, %v754_v21  ;;  %2795 = vmatpush3.bf16.msra.mxu0 %v2792_v15  ;;  %2759 = vmatpush3.bf16.msra.mxu1 %v2756_v59 }
 0x1bc   : > { %v2053_v22 = vsel %vm880_vm3, 1.0, %v2964_v11  ;;  %v2037_v23 = vsel %vm784_vm4, 1.0, %v2964_v11 }
 0x1bd   : > { %2416 = vmatprep.mubr.msk.f32.mxu0 %vm920_vm1, %v2037_v23  ;;  %2450 = vmatprep.mubr.msk.f32.mxu1 %vm920_vm1, %v2053_v22 }
 0x1be   : > { %v853_v24 = vpop.permute.xlu1 %852  ;;  %v757_v25 = vpop.permute.xlu0 %756 }
 0x1bf   : > { %vm881_vm5 = vcmp.eq.s32.totalorder %v3290_v6, %v853_v24  ;;  %vm785_vm6 = vcmp.eq.s32.totalorder %v3290_v6, %v757_v25 }
 0x1c0   : > { %v2054_v26 = vsel %vm881_vm5, 1.0, %v2964_v11  ;;  %v2038_v27 = vsel %vm785_vm6, 1.0, %v2964_v11 }
 0x1c1   : > { %2417 = vmatmul.mubr.msk.f32.gmra.mrb[8].mxu0 %vm920_vm1, %v2038_v27  ;;  %2451 = vmatmul.mubr.msk.f32.gmra.mrb[8].mxu1 %vm920_vm1, %v2054_v26 }
 0x1c2   : > { %v856_v28 = vpop.permute.xlu1 %855  ;;  %v760_v29 = vpop.permute.xlu0 %759 }
 0x1c3   : > { %vm882_vm7 = vcmp.eq.s32.totalorder %v3290_v6, %v856_v28  ;;  %vm786_vm8 = vcmp.eq.s32.totalorder %v3290_v6, %v760_v29 }
 0x1c4   : > { %v2055_v30 = vsel %vm882_vm7, 1.0, %v2964_v11  ;;  %v2039_v31 = vsel %vm786_vm8, 1.0, %v2964_v11 }
 0x1c5   : > { %2419 = vmatprep.mubr.msk.f32.mxu0 %vm920_vm1, %v2039_v31  ;;  %2453 = vmatprep.mubr.msk.f32.mxu1 %vm920_vm1, %v2055_v30 }
 0x1c6   : > { %v859_v36 = vpop.permute.xlu1 %858  ;;  %v763_v37 = vpop.permute.xlu0 %762 }
 0x1c7   : > { %vm883_vm9 = vcmp.eq.s32.totalorder %v3290_v6, %v859_v36  ;;  %vm787_vm10 = vcmp.eq.s32.totalorder %v3290_v6, %v763_v37 }
 0x1c8   : > { %v2056_v38 = vsel %vm883_vm9, 1.0, %v2964_v11  ;;  %v2040_v39 = vsel %vm787_vm10, 1.0, %v2964_v11  ;;  %vm2969_vm9 = vmmov (!%p2105_p6), 0  }
 0x1c9   : > { %2420 = vmatmul.mubr.msk.f32.gmra.mrb[10].mxu0 %vm920_vm1, %v2040_v39  ;;  %2454 = vmatmul.mubr.msk.f32.gmra.mrb[10].mxu1 %vm920_vm1, %v2056_v38 }
 0x1ca   : > { %v862_v41 = vpop.permute.xlu1 %861  ;;  %v766_v42 = vpop.permute.xlu0 %765 }
 0x1cb   : > { %vm884_vm11 = vcmp.eq.s32.totalorder %v3290_v6, %v862_v41  ;;  %vm788_vm12 = vcmp.eq.s32.totalorder %v3290_v6, %v766_v42 }
 0x1cc   : > { %v2057_v43 = vsel %vm884_vm11, 1.0, %v2964_v11  ;;  %v2041_v44 = vsel %vm788_vm12, 1.0, %v2964_v11 }
 0x1cd   : > { %2422 = vmatprep.mubr.msk.f32.mxu0 %vm920_vm1, %v2041_v44  ;;  %2456 = vmatprep.mubr.msk.f32.mxu1 %vm920_vm1, %v2057_v43 }
 0x1ce   : > { %v865_v45 = vpop.permute.xlu1 %864  ;;  %v769_v46 = vpop.permute.xlu0 %768 }
 0x1cf   : > { %vm885_vm13 = vcmp.eq.s32.totalorder %v3290_v6, %v865_v45  ;;  %vm789_vm14 = vcmp.eq.s32.totalorder %v3290_v6, %v769_v46 }
 0x1d0   : > { %v2058_v47 = vsel %vm885_vm13, 1.0, %v2964_v11  ;;  %v2042_v48 = vsel %vm789_vm14, 1.0, %v2964_v11 }
 0x1d1   : > { %2423 = vmatmul.mubr.msk.f32.gmra.mrb[12].mxu0 %vm920_vm1, %v2042_v48  ;;  %2457 = vmatmul.mubr.msk.f32.gmra.mrb[12].mxu1 %vm920_vm1, %v2058_v47 }
 0x1d2   : > { %v868_v49 = vpop.permute.xlu1 %867  ;;  %v772_v50 = vpop.permute.xlu0 %771 }
 0x1d3   : > { %vm886_vm15 = vcmp.eq.s32.totalorder %v3290_v6, %v868_v49  ;;  %vm790_vm0 = vcmp.eq.s32.totalorder %v3290_v6, %v772_v50 }
 0x1d4   : > { %v2059_v51 = vsel %vm886_vm15, 1.0, %v2964_v11  ;;  %v2043_v52 = vsel %vm790_vm0, 1.0, %v2964_v11 }
 0x1d5   : > { %2425 = vmatprep.mubr.msk.f32.mxu0 %vm920_vm1, %v2043_v52  ;;  %2459 = vmatprep.mubr.msk.f32.mxu1 %vm920_vm1, %v2059_v51 }
 0x1d6   : > { %v871_v53 = vpop.permute.xlu1 %870  ;;  %v775_v54 = vpop.permute.xlu0 %774 }
 0x1d7   : > { %vm887_vm2 = vcmp.eq.s32.totalorder %v3290_v6, %v871_v53  ;;  %vm791_vm3 = vcmp.eq.s32.totalorder %v3290_v6, %v775_v54  ;;  %v1369_v6 = vld [vmem:[%s3622_s7 + $0x70] sm:$0xff] }
 0x1d8   : > { %v2060_v55 = vsel %vm887_vm2, 1.0, %v2964_v11  ;;  %v2044_v56 = vsel %vm791_vm3, 1.0, %v2964_v11  ;;  %v2760_v61 = vpack.c.bf16 %v1370_v60, %v1369_v6 }
 0x1d9   : > { %2426 = vmatmul.mubr.msk.f32.gmra.mrb[14].mxu0 %vm920_vm1, %v2044_v56  ;;  %2460 = vmatmul.mubr.msk.f32.gmra.mrb[14].mxu1 %vm920_vm1, %v2060_v55  ;;  %vm2966_vm1 = vmmov 0  }
 0x1da   : > { %2761 = vmatprep.subr.bf16.mxu1 %v2760_v61 }
 0x1db   : > { %2763 = vmatpush3.bf16.msra.mxu1 %v2760_v61 }
 0x271   : > { %v2406_v62 = vpop.f32.mrb[0].mxu0 }
 0x272   : > { %v1035_v63 = vpop.f32.mrb[1].mxu0 }
 0x273   : > { %2550 = vmatprep.mubr.f32.mxu0 %v1035_v63 }
 0x274   : > { %2551 = vmatmul.mubr.f32.vlgmr.msra.gmra.mrb[16].mxu0 %v2406_v62 }
 0x275   : > { %v2440_v0 = vpop.f32.mrb[0].mxu1 }
 0x276   : > { %v1308_v1 = vsub.f32 %v2406_v62, %v2440_v0  ;;  %v1228_v2 = vpop.f32.mrb[1].mxu1 }
 0x277   : > { %v1307_v3 = vsub.f32 %v1035_v63, %v1228_v2 }
 0x278   : > { %v1324_v7 = vand.u32 2147483647, %v1308_v1 }
 0x279   : > { %v1323_v4 = vand.u32 2147483647, %v1307_v3 }
 0x27b   : > { %2494 = vmatprep.mubr.f32.mxu1 %v1323_v4 }
 0x27c   : > { %v2409_v8 = vpop.f32.mrb[2].mxu0  ;;  %v2443_v9 = vpop.f32.mrb[2].mxu1  ;;  %2495 = vmatmul.mubr.f32.vlgmr.msra.gmra.mrb[16].mxu1 %v1324_v7  ;;  %v2965_v7 = vmov 0.0|0.0  }
 0x27d   : > { %v1310_v10 = vsub.f32 %v2409_v8, %v2443_v9  ;;  %v1045_v12 = vpop.f32.mrb[3].mxu0  ;;  %v1238_v13 = vpop.f32.mrb[3].mxu1  ;;  %2796 = vmatprep.subr.bf16.mxu0 %v2965_v7  ;;  %2844 = vmatprep.subr.bf16.mxu1 %v2965_v7 }
 0x27e   : > { %v1309_v14 = vsub.f32 %v1045_v12, %v1238_v13  ;;  %2553 = vmatprep.mubr.f32.mxu0 %v1045_v12  ;;  %v3481_v12 = vld [vmem:[%s3623_s8] ss:$0 sm:$0xff] }
 0x27f   : > { %2554 = vmatmul.mubr.f32.gmra.mrb[18].mxu0 %v2409_v8  ;;  %v1326_v16 = vand.u32 2147483647, %v1310_v10 }
 0x280   : > { %v1325_v15 = vand.u32 2147483647, %v1309_v14 }
 0x282   : > { %2497 = vmatprep.mubr.f32.mxu1 %v1325_v15 }
 0x283   : > { %2498 = vmatmul.mubr.f32.gmra.mrb[18].mxu1 %v1326_v16 }
 0x284   : > { %v2412_v17 = vpop.f32.mrb[4].mxu0  ;;  %v2446_v18 = vpop.f32.mrb[4].mxu1 }
 0x285   : > { %v1312_v19 = vsub.f32 %v2412_v17, %v2446_v18  ;;  %v1055_v20 = vpop.f32.mrb[5].mxu0  ;;  %v1248_v21 = vpop.f32.mrb[5].mxu1 }
 0x286   : > { %v1311_v22 = vsub.f32 %v1055_v20, %v1248_v21  ;;  %2556 = vmatprep.mubr.f32.mxu0 %v1055_v20 }
 0x287   : > { %2557 = vmatmul.mubr.f32.gmra.mrb[20].mxu0 %v2412_v17  ;;  %v1328_v24 = vand.u32 2147483647, %v1312_v19 }
 0x288   : > { %v1327_v23 = vand.u32 2147483647, %v1311_v22 }
 0x28a   : > { %2500 = vmatprep.mubr.f32.mxu1 %v1327_v23 }
 0x28b   : > { %2501 = vmatmul.mubr.f32.gmra.mrb[20].mxu1 %v1328_v24 }
 0x28c   : > { %v2415_v25 = vpop.f32.mrb[6].mxu0  ;;  %v2449_v26 = vpop.f32.mrb[6].mxu1 }
 0x28d   : > { %v1314_v27 = vsub.f32 %v2415_v25, %v2449_v26  ;;  %v1065_v28 = vpop.f32.mrb[7].mxu0  ;;  %v1258_v29 = vpop.f32.mrb[7].mxu1 }
 0x28e   : > { %v1313_v30 = vsub.f32 %v1065_v28, %v1258_v29  ;;  %2559 = vmatprep.mubr.f32.mxu0 %v1065_v28 }
 0x28f   : > { %2560 = vmatmul.mubr.f32.gmra.mrb[22].mxu0 %v2415_v25  ;;  %v1330_v36 = vand.u32 2147483647, %v1314_v27 }
 0x290   : > { %v1329_v31 = vand.u32 2147483647, %v1313_v30 }
 0x292   : > { %2503 = vmatprep.mubr.f32.mxu1 %v1329_v31 }
 0x293   : > { %2504 = vmatmul.mubr.f32.gmra.mrb[22].mxu1 %v1330_v36 }
 0x294   : > { %v2418_v37 = vpop.f32.mrb[8].mxu0  ;;  %v2452_v38 = vpop.f32.mrb[8].mxu1 }
 0x295   : > { %v1316_v39 = vsub.f32 %v2418_v37, %v2452_v38  ;;  %v1075_v41 = vpop.f32.mrb[9].mxu0  ;;  %v1268_v42 = vpop.f32.mrb[9].mxu1 }
 0x296   : > { %v1315_v43 = vsub.f32 %v1075_v41, %v1268_v42  ;;  %2562 = vmatprep.mubr.f32.mxu0 %v1075_v41 }
 0x297   : > { %2563 = vmatmul.mubr.f32.gmra.mrb[24].mxu0 %v2418_v37  ;;  %v1332_v45 = vand.u32 2147483647, %v1316_v39 }
 0x298   : > { %v1331_v44 = vand.u32 2147483647, %v1315_v43 }
 0x29a   : > { %2506 = vmatprep.mubr.f32.mxu1 %v1331_v44 }
 0x29b   : > { %2507 = vmatmul.mubr.f32.gmra.mrb[24].mxu1 %v1332_v45 }
 0x29c   : > { %v2421_v46 = vpop.f32.mrb[10].mxu0  ;;  %v2455_v47 = vpop.f32.mrb[10].mxu1 }
 0x29d   : > { %v1318_v48 = vsub.f32 %v2421_v46, %v2455_v47  ;;  %v1085_v49 = vpop.f32.mrb[11].mxu0  ;;  %v1278_v50 = vpop.f32.mrb[11].mxu1 }
 0x29e   : > { %v1317_v51 = vsub.f32 %v1085_v49, %v1278_v50  ;;  %2565 = vmatprep.mubr.f32.mxu0 %v1085_v49 }
 0x29f   : > { %2566 = vmatmul.mubr.f32.gmra.mrb[26].mxu0 %v2421_v46  ;;  %v1334_v53 = vand.u32 2147483647, %v1318_v48 }
 0x2a0   : > { %v1333_v52 = vand.u32 2147483647, %v1317_v51 }
 0x2a2   : > { %2509 = vmatprep.mubr.f32.mxu1 %v1333_v52 }
 0x2a3   : > { %2510 = vmatmul.mubr.f32.gmra.mrb[26].mxu1 %v1334_v53 }
 0x2a4   : > { %v2424_v54 = vpop.f32.mrb[12].mxu0  ;;  %v2458_v55 = vpop.f32.mrb[12].mxu1 }
 0x2a5   : > { %v1320_v56 = vsub.f32 %v2424_v54, %v2458_v55  ;;  %v1095_v57 = vpop.f32.mrb[13].mxu0  ;;  %v1288_v58 = vpop.f32.mrb[13].mxu1 }
 0x2a6   : > { %v1319_v59 = vsub.f32 %v1095_v57, %v1288_v58  ;;  %2568 = vmatprep.mubr.f32.mxu0 %v1095_v57 }
 0x2a7   : > { %2569 = vmatmul.mubr.f32.gmra.mrb[28].mxu0 %v2424_v54  ;;  %v1336_v60 = vand.u32 2147483647, %v1320_v56 }
 0x2a8   : > { %v1335_v6 = vand.u32 2147483647, %v1319_v59 }
 0x2aa   : > { %2512 = vmatprep.mubr.f32.mxu1 %v1335_v6 }
 0x2ab   : > { %2513 = vmatmul.mubr.f32.gmra.mrb[28].mxu1 %v1336_v60 }
 0x2ac   : > { %v2427_v61 = vpop.f32.mrb[14].mxu0  ;;  %v2461_v62 = vpop.f32.mrb[14].mxu1 }
 0x2ad   : > { %v1322_v63 = vsub.f32 %v2427_v61, %v2461_v62  ;;  %v1105_v0 = vpop.f32.mrb[15].mxu0  ;;  %v1298_v1 = vpop.f32.mrb[15].mxu1 }
 0x2ae   : > { %v1321_v2 = vsub.f32 %v1105_v0, %v1298_v1  ;;  %2571 = vmatprep.mubr.f32.mxu0 %v1105_v0 }
 0x2af   : > { %2572 = vmatmul.mubr.f32.gmra.mrb[30].mxu0 %v2427_v61  ;;  %v1338_v4 = vand.u32 2147483647, %v1322_v63 }
 0x2b0   : > { %v1337_v3 = vand.u32 2147483647, %v1321_v2  ;;  %2606 = vmatprep.mubr.msk.f32.mxu0 %vm2966_vm1, %v2964_v11 }
 0x2b2   : > { %2515 = vmatprep.mubr.f32.mxu1 %v1337_v3 }
 0x2b3   : > { %2516 = vmatmul.mubr.f32.gmra.mrb[30].mxu1 %v1338_v4 }
 0x2b4   : > { %2612 = vmatprep.mubr.msk.f32.mxu1 %vm2966_vm1, %v2964_v11 }
 0x347   : > { %v2552_v8 = vpop.f32.mrb[16].mxu0 }
 0x348   : > { %v1582_v9 = vpop.f32.mrb[17].mxu0 }
 0x34f   : > { %v2496_v10 = vpop.f32.mrb[16].mxu1 }
 0x350   : > { %v1588_v13 = vadd.f32 %v2552_v8, %v2496_v10  ;;  %v1437_v14 = vpop.f32.mrb[17].mxu1 }
 0x351   : > { %v1583_v15 = vadd.f32 %v1582_v9, %v1437_v14 }
 0x352   : > { %v1669_v16 = vadd.f32 %v3481_v12, %v1588_v13  ;;  %v2555_v17 = vpop.f32.mrb[18].mxu0 }
 0x353   : > { %v1668_v18 = vadd.f32 %v3481_v12, %v1583_v15  ;;  %v1592_v19 = vpop.f32.mrb[19].mxu0 }
 0x355   : > { %v2797_v20 = vpack.c.bf16 %v1669_v16, %v1668_v18 }
 0x356   : > { %v2499_v21 = vpop.f32.mrb[18].mxu1 }
 0x357   : > { %v1598_v22 = vadd.f32 %v2555_v17, %v2499_v21  ;;  %v1447_v23 = vpop.f32.mrb[19].mxu1  ;;  %2798 = vmatpush3.bf16.msra.mxu0 %v2797_v20  ;;  %2852 = vmatpush3.bf16.msra.mxu1 %v2797_v20  ;;  %v1685_v21 = vshrl.u32 %v726_v5, 7 }
 0x358   : > { %v1593_v24 = vadd.f32 %v1592_v19, %v1447_v23  ;;  %2799 = vmatprep.subr.bf16.mxu0 %v2965_v7  ;;  %2845 = vmatprep.subr.bf16.mxu1 %v2965_v7 }
 0x359   : > { %v1671_v25 = vadd.f32 %v3481_v12, %v1598_v22  ;;  %v1688_v5 = vadd.s32 24, %v1685_v21 }
 0x35a   : > { %v1670_v26 = vadd.f32 %v3481_v12, %v1593_v24  ;;  %v2558_v27 = vpop.f32.mrb[20].mxu0 }
 0x35b   : > { %v1602_v28 = vpop.f32.mrb[21].mxu0 }
 0x35c   : > { %v2800_v29 = vpack.c.bf16 %v1671_v25, %v1670_v26 }
 0x35e   : > { %v2502_v30 = vpop.f32.mrb[20].mxu1  ;;  %2801 = vmatpush3.bf16.msra.mxu0 %v2800_v29  ;;  %2853 = vmatpush3.bf16.msra.mxu1 %v2800_v29 }
 0x35f   : > { %v1608_v31 = vadd.f32 %v2558_v27, %v2502_v30  ;;  %v1457_v36 = vpop.f32.mrb[21].mxu1  ;;  %2802 = vmatprep.subr.bf16.mxu0 %v2965_v7  ;;  %2846 = vmatprep.subr.bf16.mxu1 %v2965_v7  ;;  %v1687_v27 = vadd.s32 16, %v1685_v21  ;;  %v1686_v30 = vadd.s32 8, %v1685_v21 }
 0x360   : > { %v1603_v37 = vadd.f32 %v1602_v28, %v1457_v36  ;;  %v2094_v28 = vld [vmem:[%s437_s27] ss:$0 sm:$0xff]  ;;  %v1709_v36 = vld [vmem:[#allocation3] sm:$0xff] }
 0x361   : > { %v1673_v38 = vadd.f32 %v3481_v12, %v1608_v31  ;;  %vm1696_vm4 = vcmp.eq.s32.totalorder %v1687_v27, %v2094_v28  ;;  %vm1694_vm5 = vcmp.eq.s32.totalorder %v1685_v21, %v2094_v28  ;;  %v2967_v31 = vmov 1.0  }
 0x362   : > { %v1672_v39 = vadd.f32 %v3481_v12, %v1603_v37  ;;  %v2561_v41 = vpop.f32.mrb[22].mxu0  ;;  %vm1697_vm6 = vcmp.eq.s32.totalorder %v1688_v5, %v2094_v28  ;;  %vm1695_vm7 = vcmp.eq.s32.totalorder %v1686_v30, %v2094_v28  ;;  %v1831_v5 = vld [vmem:[#allocation4 + $0x18] sm:$0xff] (!%p2105_p6) }
 0x363   : > { %v1612_v42 = vpop.f32.mrb[23].mxu0 }
 0x364   : > { %v2803_v43 = vpack.c.bf16 %v1673_v38, %v1672_v39 }
 0x366   : > { %v2505_v44 = vpop.f32.mrb[22].mxu1  ;;  %2804 = vmatpush3.bf16.msra.mxu0 %v2803_v43  ;;  %2854 = vmatpush3.bf16.msra.mxu1 %v2803_v43 }
 0x367   : > { %v1618_v45 = vadd.f32 %v2561_v41, %v2505_v44  ;;  %v1467_v46 = vpop.f32.mrb[23].mxu1  ;;  %2805 = vmatprep.subr.bf16.mxu0 %v2965_v7  ;;  %2847 = vmatprep.subr.bf16.mxu1 %v2965_v7  ;;  %v1712_v44 = vld [vmem:[#allocation3 + $0x18] sm:$0xff] }
 0x368   : > { %v1613_v47 = vadd.f32 %v1612_v42, %v1467_v46 }
 0x369   : > { %v1675_v48 = vadd.f32 %v3481_v12, %v1618_v45  ;;  %v1710_v45 = vld [vmem:[#allocation3 + $0x8] sm:$0xff] }
 0x36a   : > { %v1674_v49 = vadd.f32 %v3481_v12, %v1613_v47  ;;  %v2564_v50 = vpop.f32.mrb[24].mxu0 }
 0x36b   : > { %v1622_v51 = vpop.f32.mrb[25].mxu0 }
 0x36c   : > { %v2806_v52 = vpack.c.bf16 %v1675_v48, %v1674_v49 }
 0x36e   : > { %v2508_v53 = vpop.f32.mrb[24].mxu1  ;;  %2807 = vmatpush3.bf16.msra.mxu0 %v2806_v52  ;;  %2855 = vmatpush3.bf16.msra.mxu1 %v2806_v52 }
 0x36f   : > { %v1628_v54 = vadd.f32 %v2564_v50, %v2508_v53  ;;  %v1477_v55 = vpop.f32.mrb[25].mxu1  ;;  %2808 = vmatprep.subr.bf16.mxu0 %v2965_v7  ;;  %2848 = vmatprep.subr.bf16.mxu1 %v2965_v7 }
 0x370   : > { %v1623_v56 = vadd.f32 %v1622_v51, %v1477_v55  ;;  %v1713_v51 = vld [vmem:[#allocation3 + $0x20] sm:$0xff]  ;;  %v1833_v55 = vld [vmem:[%s3625_s10] sm:$0xff] (!%p2105_p6) }
 0x371   : > { %v1677_v57 = vadd.f32 %v3481_v12, %v1628_v54 }
 0x372   : > { %v1676_v58 = vadd.f32 %v3481_v12, %v1623_v56  ;;  %v2567_v59 = vpop.f32.mrb[26].mxu0  ;;  %v1834_v56 = vld [vmem:[%s3625_s10 + $0x8] sm:$0xff] (!%p2105_p6) }
 0x373   : > { %v1632_v6 = vpop.f32.mrb[27].mxu0 }
 0x374   : > { %v2809_v60 = vpack.c.bf16 %v1677_v57, %v1676_v58  ;;  %v1835_v57 = vld [vmem:[%s3625_s10 + $0x10] sm:$0xff] (!%p2105_p6)  ;;  %v2968_v58 = vmov (!%p2105_p6), 0.0|0.0  }
 0x376   : > { %v2511_v61 = vpop.f32.mrb[26].mxu1  ;;  %2810 = vmatpush3.bf16.msra.mxu0 %v2809_v60  ;;  %2856 = vmatpush3.bf16.msra.mxu1 %v2809_v60  ;;  %v2970_v60 = vmov (!%p2105_p6), 0.0  }
 0x377   : > { %v1638_v62 = vadd.f32 %v2567_v59, %v2511_v61  ;;  %v1487_v63 = vpop.f32.mrb[27].mxu1  ;;  %2811 = vmatprep.subr.bf16.mxu0 %v2965_v7  ;;  %2849 = vmatprep.subr.bf16.mxu1 %v2965_v7  ;;  %v2821_v59 = vpack.c.bf16 (!%p2105_p6), %v1834_v56, %v1833_v55 }
 0x378   : > { %v1633_v0 = vadd.f32 %v1632_v6, %v1487_v63  ;;  %v1836_v6 = vld [vmem:[%s3625_s10 + $0x18] sm:$0xff] (!%p2105_p6)  ;;  %v1838_v63 = vld [vmem:[%s3625_s10 + $0x28] sm:$0xff] (!%p2105_p6) }
 0x379   : > { %v1679_v1 = vadd.f32 %v3481_v12, %v1638_v62  ;;  %v2824_v61 = vpack.c.bf16 (!%p2105_p6), %v1836_v6, %v1835_v57  ;;  %v1837_v62 = vld [vmem:[%s3625_s10 + $0x20] sm:$0xff] (!%p2105_p6) }
 0x37a   : > { %v1678_v2 = vadd.f32 %v3481_v12, %v1633_v0  ;;  %v2570_v3 = vpop.f32.mrb[28].mxu0  ;;  %v2827_v0 = vpack.c.bf16 (!%p2105_p6), %v1838_v63, %v1837_v62 }
 0x37b   : > { %v1642_v4 = vpop.f32.mrb[29].mxu0 }
 0x37c   : > { %v2812_v8 = vpack.c.bf16 %v1679_v1, %v1678_v2  ;;  %v1839_v1 = vld [vmem:[%s3625_s10 + $0x30] sm:$0xff] (!%p2105_p6)  ;;  %v1840_v2 = vld [vmem:[%s3625_s10 + $0x38] sm:$0xff] (!%p2105_p6) }
 0x37e   : > { %v2514_v9 = vpop.f32.mrb[28].mxu1  ;;  %2813 = vmatpush3.bf16.msra.mxu0 %v2812_v8  ;;  %2857 = vmatpush3.bf16.msra.mxu1 %v2812_v8  ;;  %v1842_v8 = vld [vmem:[%s3625_s10 + $0x48] sm:$0xff] (!%p2105_p6) }
 0x37f   : > { %v1648_v10 = vadd.f32 %v2570_v3, %v2514_v9  ;;  %v1497_v13 = vpop.f32.mrb[29].mxu1  ;;  %2814 = vmatprep.subr.bf16.mxu0 %v2965_v7  ;;  %2850 = vmatprep.subr.bf16.mxu1 %v2965_v7  ;;  %v2830_v3 = vpack.c.bf16 (!%p2105_p6), %v1840_v2, %v1839_v1 }
 0x380   : > { %v1643_v14 = vadd.f32 %v1642_v4, %v1497_v13  ;;  %v1841_v4 = vld [vmem:[%s3625_s10 + $0x40] sm:$0xff] (!%p2105_p6)  ;;  %v1844_v13 = vld [vmem:[%s3625_s10 + $0x58] sm:$0xff] (!%p2105_p6) }
 0x381   : > { %v1681_v15 = vadd.f32 %v3481_v12, %v1648_v10  ;;  %v2833_v9 = vpack.c.bf16 (!%p2105_p6), %v1842_v8, %v1841_v4  ;;  %v1843_v10 = vld [vmem:[%s3625_s10 + $0x50] sm:$0xff] (!%p2105_p6) }
 0x382   : > { %v1680_v16 = vadd.f32 %v3481_v12, %v1643_v14  ;;  %v2573_v17 = vpop.f32.mrb[30].mxu0  ;;  %v2836_v14 = vpack.c.bf16 (!%p2105_p6), %v1844_v13, %v1843_v10 }
 0x383   : > { %v1652_v18 = vpop.f32.mrb[31].mxu0 }
 0x384   : > { %v2815_v19 = vpack.c.bf16 %v1681_v15, %v1680_v16  ;;  %v1845_v15 = vld [vmem:[%s3625_s10 + $0x60] sm:$0xff] (!%p2105_p6)  ;;  %v1846_v16 = vld [vmem:[%s3625_s10 + $0x68] sm:$0xff] (!%p2105_p6) }
 0x386   : > { %v2517_v20 = vpop.f32.mrb[30].mxu1  ;;  %2816 = vmatpush3.bf16.msra.mxu0 %v2815_v19  ;;  %2858 = vmatpush3.bf16.msra.mxu1 %v2815_v19  ;;  %v1848_v19 = vld [vmem:[%s3625_s10 + $0x78] sm:$0xff] (!%p2105_p6) }
 0x387   : > { %v1658_v22 = vadd.f32 %v2573_v17, %v2517_v20  ;;  %v1507_v23 = vpop.f32.mrb[31].mxu1  ;;  %2817 = vmatprep.subr.bf16.mxu0 %v2965_v7  ;;  %2851 = vmatprep.subr.bf16.mxu1 %v2965_v7  ;;  %v1689_v7 = vadd.s32 32, %v1685_v21  ;;  %v2839_v17 = vpack.c.bf16 (!%p2105_p6), %v1846_v16, %v1845_v15 }
 0x388   : > { %v1653_v24 = vadd.f32 %v1652_v18, %v1507_v23  ;;  %v1847_v18 = vld [vmem:[%s3625_s10 + $0x70] sm:$0xff] (!%p2105_p6) }
 0x389   : > { %v1683_v25 = vadd.f32 %v3481_v12, %v1658_v22  ;;  %vm1698_vm8 = vcmp.eq.s32.totalorder %v1689_v7, %v2094_v28  ;;  %v2842_v20 = vpack.c.bf16 (!%p2105_p6), %v1848_v19, %v1847_v18 }
 0x38a   : > { %v1682_v26 = vadd.f32 %v3481_v12, %v1653_v24  ;;  %v1711_v12 = vld [vmem:[#allocation3 + $0x10] sm:$0xff] }
 0x38c   : > { %v2818_v29 = vpack.c.bf16 %v1683_v25, %v1682_v26 }
 0x38e   : > { %2819 = vmatpush3.bf16.msra.mxu0 %v2818_v29  ;;  %2859 = vmatpush3.bf16.msra.mxu1 %v2818_v29 }
 0x38f   : > { %2820 = vmatprep.subr.bf16.mxu0 (!%p2105_p6), %v2968_v58  ;;  %2876 = vmatprep.subr.bf16.mxu1 (!%p2105_p6), %v2968_v58 }
 0x391   : > { %2613 = vmatmul.mubr.msk.f32.vlgmr.msra.gmra.mrb[32].mxu1 %vm1696_vm4, %v2967_v31  ;;  %2607 = vmatmul.mubr.msk.f32.vlgmr.msra.gmra.mrb[32].mxu0 %vm1694_vm5, %v2967_v31 }
 0x392   : > { %2615 = vmatprep.mubr.msk.f32.mxu1 %vm2966_vm1, %v2964_v11  ;;  %2609 = vmatprep.mubr.msk.f32.mxu0 %vm2966_vm1, %v2964_v11 }
 0x393   : > { %2822 = vmatpush3.bf16.msra.mxu0 (!%p2105_p6), %v2821_v59  ;;  %2884 = vmatpush3.bf16.msra.mxu1 (!%p2105_p6), %v2821_v59 }
 0x394   : > { %2823 = vmatprep.subr.bf16.mxu0 (!%p2105_p6), %v2968_v58  ;;  %2877 = vmatprep.subr.bf16.mxu1 (!%p2105_p6), %v2968_v58 }
 0x395   : > { %2616 = vmatmul.mubr.msk.f32.gmra.mrb[34].mxu1 %vm1697_vm6, %v2967_v31  ;;  %2610 = vmatmul.mubr.msk.f32.gmra.mrb[34].mxu0 %vm1695_vm7, %v2967_v31 }
 0x396   : > { %2618 = vmatprep.mubr.msk.f32.mxu1 %vm2966_vm1, %v2964_v11  ;;  %2653 = vmatprep.mubr.msk.f32.mxu0 (!%p2105_p6), %vm2969_vm9, %v2970_v60 }
 0x397   : > { %2825 = vmatpush3.bf16.msra.mxu0 (!%p2105_p6), %v2824_v61  ;;  %2885 = vmatpush3.bf16.msra.mxu1 (!%p2105_p6), %v2824_v61 }
 0x398   : > { %2826 = vmatprep.subr.bf16.mxu0 (!%p2105_p6), %v2968_v58  ;;  %2878 = vmatprep.subr.bf16.mxu1 (!%p2105_p6), %v2968_v58 }
 0x399   : > { %2619 = vmatmul.mubr.msk.f32.gmra.mrb[36].mxu1 %vm1698_vm8, %v2967_v31 }
 0x39a   : > { %2662 = vmatprep.mubr.msk.f32.mxu1 (!%p2105_p6), %vm2969_vm9, %v2970_v60 }
 0x39b   : > { %2828 = vmatpush3.bf16.msra.mxu0 (!%p2105_p6), %v2827_v0  ;;  %2886 = vmatpush3.bf16.msra.mxu1 (!%p2105_p6), %v2827_v0 }
 0x39c   : > { %2829 = vmatprep.subr.bf16.mxu0 (!%p2105_p6), %v2968_v58  ;;  %2879 = vmatprep.subr.bf16.mxu1 (!%p2105_p6), %v2968_v58 }
 0x39f   : > { %2831 = vmatpush3.bf16.msra.mxu0 (!%p2105_p6), %v2830_v3  ;;  %2887 = vmatpush3.bf16.msra.mxu1 (!%p2105_p6), %v2830_v3 }
 0x3a0   : > { %2832 = vmatprep.subr.bf16.mxu0 (!%p2105_p6), %v2968_v58  ;;  %2880 = vmatprep.subr.bf16.mxu1 (!%p2105_p6), %v2968_v58 }
 0x3a3   : > { %2834 = vmatpush3.bf16.msra.mxu0 (!%p2105_p6), %v2833_v9  ;;  %2888 = vmatpush3.bf16.msra.mxu1 (!%p2105_p6), %v2833_v9 }
 0x3a4   : > { %2835 = vmatprep.subr.bf16.mxu0 (!%p2105_p6), %v2968_v58  ;;  %2881 = vmatprep.subr.bf16.mxu1 (!%p2105_p6), %v2968_v58 }
 0x3a7   : > { %2837 = vmatpush3.bf16.msra.mxu0 (!%p2105_p6), %v2836_v14  ;;  %2889 = vmatpush3.bf16.msra.mxu1 (!%p2105_p6), %v2836_v14 }
 0x3a8   : > { %2838 = vmatprep.subr.bf16.mxu0 (!%p2105_p6), %v2968_v58  ;;  %2882 = vmatprep.subr.bf16.mxu1 (!%p2105_p6), %v2968_v58 }
 0x3ab   : > { %2840 = vmatpush3.bf16.msra.mxu0 (!%p2105_p6), %v2839_v17  ;;  %2890 = vmatpush3.bf16.msra.mxu1 (!%p2105_p6), %v2839_v17 }
 0x3ac   : > { %2841 = vmatprep.subr.bf16.mxu0 (!%p2105_p6), %v2968_v58  ;;  %2883 = vmatprep.subr.bf16.mxu1 (!%p2105_p6), %v2968_v58 }
 0x3af   : > { %2843 = vmatpush3.bf16.msra.mxu0 (!%p2105_p6), %v2842_v20  ;;  %2891 = vmatpush3.bf16.msra.mxu1 (!%p2105_p6), %v2842_v20 }
 0x464   : > { %v1790_v37 = vpop.f32.mrb[32].mxu1  ;;  %v1780_v38 = vpop.f32.mrb[32].mxu0 }
 0x465   : > { %v1806_v39 = vadd.f32 %v1790_v37, %v1711_v12  ;;  %v2614_v41 = vpop.f32.mrb[33].mxu1  ;;  %v1804_v42 = vadd.f32 %v1780_v38, %v1709_v36  ;;  %v2608_v43 = vpop.f32.mrb[33].mxu0  ;;  %v1829_v36 = vld [vmem:[#allocation4 + $0x8] sm:$0xff] (!%p2105_p6)  ;;  %v1832_v37 = vld [vmem:[#allocation4 + $0x20] sm:$0xff] (!%p2105_p6) }
 0x467   : > { %1811 = vst [vmem:[#allocation3 + $0x10] sm:$0xff] %v1806_v39  ;;  %1809 = vst [vmem:[#allocation3] sm:$0xff] %v1804_v42 }
 0x468   : > { %v1795_v46 = vpop.f32.mrb[34].mxu1  ;;  %v1785_v47 = vpop.f32.mrb[34].mxu0 }
 0x469   : > { %v1807_v48 = vadd.f32 %v1795_v46, %v1712_v44  ;;  %v2617_v49 = vpop.f32.mrb[35].mxu1  ;;  %v1805_v50 = vadd.f32 %v1785_v47, %v1710_v45  ;;  %v2611_v11 = vpop.f32.mrb[35].mxu0  ;;  %1817 = sbr.rel (%p2105_p6) target bundleno = 1360 (0x550), region = 76  ;;  %v1830_v44 = vld [vmem:[#allocation4 + $0x10] sm:$0xff] (!%p2105_p6) }
 0x46b   : > { %1812 = vst [vmem:[#allocation3 + $0x18] sm:$0xff] %v1807_v48  ;;  %1810 = vst [vmem:[#allocation3 + $0x8] sm:$0xff] %v1805_v50 }
 0x46c   : > { %v1800_v52 = vpop.f32.mrb[36].mxu1 }
 0x46d   : > { %v1808_v53 = vadd.f32 %v1800_v52, %v1713_v51  ;;  %v2620_v54 = vpop.f32.mrb[37].mxu1 }
 0x46e   : > { %v1818_v21 = vld [vmem:[#allocation3] sm:$0xff] (!%p2105_p6)  ;;  %v1820_v29 = vld [vmem:[#allocation3 + $0x10] sm:$0xff] (!%p2105_p6) }
 0x46f   : > { %1813 = vst [vmem:[#allocation3 + $0x20] sm:$0xff] %v1808_v53  ;;  %v1823_v23 = vadd.f32 (!%p2105_p6), %v1818_v21, %v3235_v32  ;;  %v1825_v32 = vadd.f32 (!%p2105_p6), %v1820_v29, %v3239_v34 }
 0x471   : > { %2654 = vmatmul.mubr.f32.vlgmr.msra.gmra.mrb[0].mxu0 %v1823_v23 }
 0x472   : > { %v1821_v22 = vld [vmem:[#allocation3 + $0x18] sm:$0xff]  ;;  %v1819_v25 = vld [vmem:[#allocation3 + $0x8] sm:$0xff]  ;;  %2656 = vmatprep.mubr.msk.f32.mxu0 %vm2969_vm9, %v2970_v60 }
 0x473   : > { %v1826_v24 = vadd.f32 %v1821_v22, %v3241_v35  ;;  %v1824_v27 = vadd.f32 %v1819_v25, %v3237_v33  ;;  %v1828_v35 = vld [vmem:[#allocation4] sm:$0xff] }
 0x475   : > { %2663 = vmatmul.mubr.f32.vlgmr.msra.gmra.mrb[0].mxu1 %v1826_v24  ;;  %2657 = vmatmul.mubr.f32.gmra.mrb[2].mxu0 %v1824_v27 }
 0x476   : > { %v1822_v26 = vld [vmem:[#allocation3 + $0x20] sm:$0xff]  ;;  %2665 = vmatprep.mubr.msk.f32.mxu1 %vm2969_vm9, %v2970_v60  ;;  %2659 = vmatprep.mubr.msk.f32.mxu0 %vm2969_vm9, %v2970_v60 }
 0x477   : > { %v1827_v28 = vadd.f32 %v1822_v26, %v3249_v40 }
 0x479   : > { %2666 = vmatmul.mubr.f32.gmra.mrb[2].mxu1 %v1827_v28  ;;  %2660 = vmatmul.mubr.f32.gmra.mrb[4].mxu0 %v1825_v32 }
 0x544   : > { %v1915_v33 = vpop.f32.mrb[0].mxu0 }
 0x545   : > { %v1939_v40 = vadd.f32 %v1915_v33, %v1828_v35  ;;  %v2655_v31 = vpop.f32.mrb[1].mxu0 }
 0x547   : > { %1944 = vst [vmem:[#allocation4] sm:$0xff] %v1939_v40 }
 0x548   : > { %v1930_v30 = vpop.f32.mrb[0].mxu1  ;;  %v1920_v38 = vpop.f32.mrb[2].mxu0 }
 0x549   : > { %v1942_v7 = vadd.f32 %v1930_v30, %v1831_v5  ;;  %v2664_v12 = vpop.f32.mrb[1].mxu1  ;;  %v1940_v41 = vadd.f32 %v1920_v38, %v1829_v36  ;;  %v2658_v34 = vpop.f32.mrb[3].mxu0 }
 0x54b   : > { %1947 = vst [vmem:[#allocation4 + $0x18] sm:$0xff] %v1942_v7  ;;  %1945 = vst [vmem:[#allocation4 + $0x8] sm:$0xff] %v1940_v41 }
 0x54c   : > { %v1935_v39 = vpop.f32.mrb[2].mxu1  ;;  %v1925_v45 = vpop.f32.mrb[4].mxu0 }
 0x54d   : > { %v1943_v42 = vadd.f32 %v1935_v39, %v1832_v37  ;;  %v2667_v43 = vpop.f32.mrb[3].mxu1  ;;  %v1941_v46 = vadd.f32 %v1925_v45, %v1830_v44  ;;  %v2661_v47 = vpop.f32.mrb[5].mxu0 }
 0x54f   : > { %1948 = vst [vmem:[#allocation4 + $0x20] sm:$0xff] %v1943_v42  ;;  %1946 = vst [vmem:[#allocation4 + $0x10] sm:$0xff] %v1941_v46 }
 0x550 PF: > { %p2896_p7 = scmp.eq.s32.totalorder %s3045_s22, 2  ;;  %s2971_s24 = smov [#allocation4]  }
 0x551   : > { %s1955_s27 = sshll.u32 %s2971_s24, 4  ;;  %s1956_s27 = int_to_ptr.vmem [resolvable:$true] %s1955_s27 }
 0x552   : > { %s2922_s23 = scalar_lea.vmem %s1956_s27, 640  ;;  %p2929_p11 = scmp.lt.s32.totalorder %s1956_s27, %s1956_s27 }
 0x553   : > { %p2923_p8 = scmp.ne.s32.totalorder %s1956_s27, %s2922_s23  ;;  %p2930_p12 = scmp.lt.s32.totalorder %s2922_s23, %s2922_s23 }
 0x555   : > { %p2924_p9 = pnand %p2923_p8, %p2896_p7  ;;  %p2931_p13 = por %p2930_p12, %p2929_p11 }
 0x557   : > { %p2925_p10 = pneg %p2924_p9 }
 0x559   : > { %p2932_p0 = pnand %p2931_p13, %p2925_p10 }
 0x55b   : > { %2935 = shalt.err (!%p2932_p0)
}
 0x55c   : > { %s2936_s28 = scalar_lea.hbm %s3627_s12, 640 }
 0x55d   : > { %p2937_p1 = scmp.ne.s32.totalorder %s3627_s12, %s2936_s28  ;;  %p2942_p4 = scmp.lt.u32.totalorder %s2936_s28, %s3627_s12 }
 0x55f   : > { %p2938_p2 = pnand %p2937_p1, %p2896_p7 }
 0x561   : > { %p2939_p3 = pneg %p2938_p2 }
 0x563   : > { %p2944_p5 = pnand %p2942_p4, %p2939_p3 }
 0x565   : > { %2947 = shalt.err (!%p2944_p5)
}
 0x566   : > { %s2972_s17 = smov 128   ;;  %s2973_s18 = smov 8  }
 0x567   : > { %2893 = dma.vmem_to_hbm [thread:$0]  (%p2896_p7), %s1956_s27, 640, %s3627_s12, [#allocation5], %s2972_s17, %s2972_s17, %s2973_s18  }
 0x568   : > { %2953 = dma.done.wait (%p2896_p7), [#allocation5], 640  }
 0x569   : > { %2955 = vsyncadd (%p2896_p7), [#allocation5], 4294966656 }
 0x56a PF: > { %s23_s21 = sadd.s32 1, %s2958_s21  }
 0x56b   : > { %p20_p6 = scmp.ge.s32.totalorder %s23_s21, 5  }
 0x56d   :  { %22 = sbr.rel (!%p20_p6) target bundleno = 1 (0x1), region = 109 }
 0x574   :  { %1971 = vsyncpa [#allocation5], 1 }
 0x575   :  { %1973 = vsyncpa [#allocation5 + $0x1], 1 }

</bundles_post_ra>
